<compile_context>
chip_gen: v7x
topology: tpu7x:2x2x1
jax: 0.10.0
libtpu: 0.0.40
codegen_flags: <defaults>
</compile_context>

<pallas_src>
import jax
import jax.numpy as jnp
from jax.experimental import pallas as pl
from jax.experimental.pallas import tpu as pltpu


def _round_up(x, m):
    return (x + m - 1) // m * m


# ---------------------------------------------------------------------------
# Kernel
# ---------------------------------------------------------------------------
def _biaffine_kernel(x1_ref, x2_ref, wbig_ref, x2big_ref, sel_ref, b_ref, o_ref):
    od_pad = sel_ref.shape[0]            # round_up(O*D, 128): 128-aligned lane split

    x1 = x1_ref[...]                     # (TN, D)
    x2 = x2_ref[...]                     # (TN, D)

    # Two fused, lane-dense MXU pushes.
    u_big = jnp.dot(x1, wbig_ref[...], preferred_element_type=jnp.float32)   # (TN, OD_pad+O_pad)
    v_big = jnp.dot(x2, x2big_ref[...], preferred_element_type=jnp.float32)  # (TN, OD_pad+O_pad)

    u      = u_big[:, :od_pad]           # bilinear intermediate  x1 @ W_r
    lin1   = u_big[:, od_pad:]           # x1 @ L1^T
    x2_rep = v_big[:, :od_pad]           # x2 replicated O times along lanes
    lin2   = v_big[:, od_pad:]           # x2 @ L2^T

    # bilinear[n, o] = sum_j u[n, o*D + j] * x2[n, j]
    # elementwise product, then a lane segment-sum via matmul with a constant
    # block-diagonal selector (no in-kernel reshape; result stays lane-dense).
    prod = u * x2_rep                                                        # (TN, OD_pad)
    bil = jnp.dot(prod, sel_ref[...], preferred_element_type=jnp.float32)    # (TN, O_pad)
    # NOTE: for D that is a multiple of 128 a reshape + sum(axis=-1) on the XLU
    # would remove sel entirely; the selector path is kept for sub-128 D.

    out = bil + lin1 + lin2 + b_ref[...]
    o_ref[...] = out.astype(o_ref.dtype)                                     # unmasked store


# ---------------------------------------------------------------------------
# Parameter packing (done ONCE per parameter set — hoisted out of the forward)
# ---------------------------------------------------------------------------
def pack_biaffine_params(w, l_full, b, dtype=jnp.float32):
    """Re-lay-out BiaffineAttention parameters for the kernel.

    w: (O, D, D) bilinear weight; l_full: (O, 2D) linear weight; b: (O,) or (1, O).
    """
    o, d, d2 = w.shape
    assert d == d2 and l_full.shape == (o, 2 * d)
    od = o * d
    od_pad = _round_up(od, 128)          # 128-aligned lane split for u_big / v_big
    o_pad = _round_up(o, 128)            # lane-dense output width

    # W_r[i, o*D + j] = W[o, i, j]; append L1^T as extra columns.
    w_r = jnp.transpose(w, (1, 0, 2)).reshape(d, od).astype(dtype)
    w_big = jnp.zeros((d, od_pad + o_pad), dtype)
    w_big = w_big.at[:, :od].set(w_r)
    w_big = w_big.at[:, od_pad:od_pad + o].set(l_full[:, :d].T.astype(dtype))

    # Block-identity lane replication of x2 (replaces in-kernel jnp.tile),
    # fused with L2^T so one MXU push produces both x2_rep and lin2.
    rep = jnp.tile(jnp.eye(d, dtype=dtype), (1, o))                 # (D, O*D)
    x2_big = jnp.zeros((d, od_pad + o_pad), dtype)
    x2_big = x2_big.at[:, :od].set(rep)
    x2_big = x2_big.at[:, od_pad:od_pad + o].set(l_full[:, d:].T.astype(dtype))

    # Segment-sum selector: sel[k, c] = 1 iff k < O*D and k // D == c.
    k_idx = jnp.arange(od_pad)[:, None]
    c_idx = jnp.arange(o_pad)[None, :]
    sel = ((k_idx // d == c_idx) & (k_idx < od)).astype(dtype)      # (OD_pad, O_pad)

    b_pad = jnp.zeros((1, o_pad), dtype).at[:, :o].set(
        jnp.reshape(b, (1, o)).astype(dtype))

    return {
        "w_big": w_big, "x2_big": x2_big, "sel": sel, "b": b_pad,
        "in_features": d, "out_features": o, "od_pad": od_pad, "o_pad": o_pad,
    }


# ---------------------------------------------------------------------------
# Forward wrapper
# ---------------------------------------------------------------------------
_VMEM_TARGET = 40 << 20      # conservative target (v7x has 64 MiB physical / TC)
_VMEM_LIMIT_CAP = 56 << 20


def _choose_tile_n(n, d, od_pad, o_pad, out_itemsize, resident_bytes, max_tile_n):
    # Bytes that scale with tile_n: double-buffered x1/x2/out tiles plus the
    # in-kernel f32 intermediates (u_big, v_big, prod, bil/out temporaries).
    per_row = (2 * 2 * d * 4
               + 2 * o_pad * out_itemsize
               + 4 * 3 * (od_pad + o_pad)
               + 4 * 2 * o_pad)
    budget = max(2 << 20, _VMEM_TARGET - resident_bytes)
    cap = max(8, (budget // per_row) // 8 * 8)
    tile = min(max_tile_n, cap)
    if n > 8:
        # Keep the parallel grid length >= 2 so both of v7x's TensorCores get
        # work (harmless on single-TC v5e/v6e).
        tile = min(tile, _round_up(n, 16) // 2)
    tile = max(8, min(tile, _round_up(n, 8)))
    return tile, per_row


def biaffine_attention_packed(x1, x2, params, *, max_tile_n=1024, out_dtype=None):
    """x1, x2: (N, D); params: pack_biaffine_params(...) output -> (N, O)."""
    n, d = x1.shape
    assert x2.shape == (n, d) and d == params["in_features"]
    o = params["out_features"]
    od_pad, o_pad = params["od_pad"], params["o_pad"]
    out_dtype = x1.dtype if out_dtype is None else out_dtype
    out_itemsize = jnp.dtype(out_dtype).itemsize

    w_big, x2_big, sel, b_pad = (params["w_big"], params["x2_big"],
                                 params["sel"], params["b"])
    resident_bytes = int(w_big.nbytes + x2_big.nbytes + sel.nbytes + b_pad.nbytes)

    tile_n, per_row = _choose_tile_n(n, d, od_pad, o_pad, out_itemsize,
                                     resident_bytes, max_tile_n)
    grid = (pl.cdiv(n, tile_n),)         # no jnp.pad: Pallas masks the edge block
                                         # (safe: no cross-row reduction)

    vmem_need = resident_bytes + per_row * tile_n
    vmem_limit = int(min(_VMEM_LIMIT_CAP, max(32 << 20, vmem_need + (8 << 20))))

    # Advisory cost estimate so XLA schedules around the call sensibly.
    flops = n * (2 * 2 * d * (od_pad + o_pad)     # u_big + v_big MXU pushes
                 + od_pad                         # elementwise product
                 + 2 * od_pad * o_pad             # segment-sum matmul
                 + 3 * o_pad)                     # adds + bias
    bytes_accessed = (4 * 2 * n * d + resident_bytes + n * o_pad * out_itemsize)

    # TODO(synk): for O << 128 on the critical path at very large N, pack
    # 128//O row-groups into the 128-lane output slab (or emit bf16) to cut the
    # padded-output HBM writeback; kept exact f32 lane-dense output here.

    row_spec = lambda shape: pl.BlockSpec(shape, lambda i: (i, 0))   # tiled over N

    def run(resident_mode):
        kw = {} if resident_mode is None else {"pipeline_mode": resident_mode}
        full_spec = lambda shape: pl.BlockSpec(shape, lambda i: (0, 0), **kw)
        return pl.pallas_call(
            _biaffine_kernel,
            out_shape=jax.ShapeDtypeStruct((n, o_pad), out_dtype),
            grid_spec=pltpu.PrefetchScalarGridSpec(
                num_scalar_prefetch=0,
                grid=grid,
                in_specs=[
                    row_spec((tile_n, d)),                 # x1 tile
                    row_spec((tile_n, d)),                 # x2 tile
                    full_spec((d, od_pad + o_pad)),        # [W_r | L1^T]   (resident)
                    full_spec((d, od_pad + o_pad)),        # [RepI | L2^T]  (resident)
                    full_spec((od_pad, o_pad)),            # selector       (resident)
                    full_spec((1, o_pad)),                 # bias           (resident)
                ],
                out_specs=row_spec((tile_n, o_pad)),       # lane-dense output block
            ),
            compiler_params=pltpu.CompilerParams(
                dimension_semantics=("parallel",),
                vmem_limit_bytes=vmem_limit),
            cost_estimate=pl.CostEstimate(
                flops=flops, transcendentals=0, bytes_accessed=bytes_accessed),
        )(x1, x2, w_big, x2_big, sel, b_pad)

    try:
        # Single-buffer the grid-invariant resident weights (halves their VMEM,
        # important under v7x's 64 MiB VMEM).
        out = run(pl.Buffered(1))
    except Exception:
        # Fallback (e.g. jax build without pipeline_mode support): default
        # double-buffering — residents are still resident, just 2x-buffered.
        out = run(None)

    return out[:, :o]


def biaffine_attention(x1, x2, w, l_full, b, **kwargs):
    """One-shot convenience wrapper. For repeated calls, pack params once with
    pack_biaffine_params() and call biaffine_attention_packed()."""
    return biaffine_attention_packed(x1, x2, pack_biaffine_params(w, l_full, b), **kwargs)


def biaffine_reference(x1, x2, w, l_full, b):
    bil = jnp.einsum("ni,oij,nj->no", x1, w, x2)
    lin = jnp.concatenate([x1, x2], axis=-1) @ l_full.T + jnp.reshape(b, (1, -1))
    return bil + lin


if __name__ == "__main__":
    # Small shapes consistent with the module (docstring example uses O=4);
    # batch large enough to exercise the N grid (grid length >= 2).
    batch, in_features, out_features = 256, 32, 4

    key = jax.random.PRNGKey(0)
    k1, k2, kw, kl, kb = jax.random.split(key, 5)

    # Deterministic parameter init (mimics the uniform fan-in ranges of
    # nn.Bilinear / nn.Linear reset_parameters; exact values are synthetic).
    bound_bil = 1.0 / jnp.sqrt(in_features)
    bound_lin = 1.0 / jnp.sqrt(2 * in_features)
    w = jax.random.uniform(kw, (out_features, in_features, in_features),
                           jnp.float32, -bound_bil, bound_bil)
    l_full = jax.random.uniform(kl, (out_features, 2 * in_features),
                                jnp.float32, -bound_lin, bound_lin)
    b = jax.random.uniform(kb, (1, out_features), jnp.float32,
                           -bound_lin, bound_lin)

    x1 = jax.random.normal(k1, (batch, in_features), jnp.float32)
    x2 = jax.random.normal(k2, (batch, in_features), jnp.float32)

    # Pack the weights ONCE (hoisted re-layout), then run the kernel.
    params = pack_biaffine_params(w, l_full, b)

    out = biaffine_attention_packed(x1, x2, params)
    out = jax.block_until_ready(out)

    ref = biaffine_reference(x1, x2, w, l_full, b)
    assert out.shape == (batch, out_features)
    assert jnp.allclose(out, ref, atol=1e-4, rtol=1e-4), "mismatch vs reference"

    print("KERNEL_OK")
</pallas_src>

<mosaic_0001>
module attributes {stable_mosaic.version = 11 : i64} {
  func.func @_biaffine_kernel(%arg0: i32, %arg1: memref<128x32xf32, #tpu.memory_space<vmem>>, %arg2: memref<128x32xf32, #tpu.memory_space<vmem>>, %arg3: memref<32x256xf32, #tpu.memory_space<vmem>>, %arg4: memref<32x256xf32, #tpu.memory_space<vmem>>, %arg5: memref<128x128xf32, #tpu.memory_space<vmem>>, %arg6: memref<1x128xf32, #tpu.memory_space<vmem>>, %arg7: memref<128x128xf32, #tpu.memory_space<vmem>>) attributes {dimension_semantics = [#tpu.dimension_semantics<parallel>], iteration_bounds = array<i64: 2>, scalar_prefetch = 0 : i64, scratch_operands = 0 : i64, tpu.core_type = #tpu.core_type<tc>, window_params = [{transform_indices = @transform_0, window_bounds = array<i64: 128, 32>}, {transform_indices = @transform_1, window_bounds = array<i64: 128, 32>}, {pipeline_mode = #tpu.pipeline_mode<synchronous>, transform_indices = @transform_2, window_bounds = array<i64: 32, 256>}, {pipeline_mode = #tpu.pipeline_mode<synchronous>, transform_indices = @transform_3, window_bounds = array<i64: 32, 256>}, {pipeline_mode = #tpu.pipeline_mode<synchronous>, transform_indices = @transform_4, window_bounds = array<i64: 128, 128>}, {pipeline_mode = #tpu.pipeline_mode<synchronous>, transform_indices = @transform_5, window_bounds = array<i64: 1, 128>}, {transform_indices = @transform_6, window_bounds = array<i64: 128, 128>}]} {
    %c0 = arith.constant 0 : index
    %c0_0 = arith.constant 0 : index
    %0 = vector.load %arg1[%c0, %c0_0] : memref<128x32xf32, #tpu.memory_space<vmem>>, vector<128x32xf32>
    %c0_1 = arith.constant 0 : index
    %c0_2 = arith.constant 0 : index
    %1 = vector.load %arg2[%c0_1, %c0_2] : memref<128x32xf32, #tpu.memory_space<vmem>>, vector<128x32xf32>
    %c0_3 = arith.constant 0 : index
    %c0_4 = arith.constant 0 : index
    %2 = vector.load %arg3[%c0_3, %c0_4] : memref<32x256xf32, #tpu.memory_space<vmem>>, vector<32x256xf32>
    %cst = arith.constant dense<0.000000e+00> : vector<128x256xf32>
    %3 = tpu.matmul %0, %2, %cst {dimension_numbers = #tpu.dot_dimension_numbers<[1], [0], [0], [1], [0, 0, 1, 1], [], []>} : vector<128x32xf32>, vector<32x256xf32>, vector<128x256xf32> -> vector<128x256xf32>
    %c0_5 = arith.constant 0 : index
    %c0_6 = arith.constant 0 : index
    %4 = vector.load %arg4[%c0_5, %c0_6] : memref<32x256xf32, #tpu.memory_space<vmem>>, vector<32x256xf32>
    %cst_7 = arith.constant dense<0.000000e+00> : vector<128x256xf32>
    %5 = tpu.matmul %1, %4, %cst_7 {dimension_numbers = #tpu.dot_dimension_numbers<[1], [0], [0], [1], [0, 0, 1, 1], [], []>} : vector<128x32xf32>, vector<32x256xf32>, vector<128x256xf32> -> vector<128x256xf32>
    %6 = vector.extract_strided_slice %3 {offsets = [0, 0], sizes = [128, 128], strides = [1, 1]} : vector<128x256xf32> to vector<128x128xf32>
    %7 = vector.extract_strided_slice %3 {offsets = [0, 128], sizes = [128, 128], strides = [1, 1]} : vector<128x256xf32> to vector<128x128xf32>
    %8 = vector.extract_strided_slice %5 {offsets = [0, 0], sizes = [128, 128], strides = [1, 1]} : vector<128x256xf32> to vector<128x128xf32>
    %9 = vector.extract_strided_slice %5 {offsets = [0, 128], sizes = [128, 128], strides = [1, 1]} : vector<128x256xf32> to vector<128x128xf32>
    %10 = arith.mulf %6, %8 : vector<128x128xf32>
    %c0_8 = arith.constant 0 : index
    %c0_9 = arith.constant 0 : index
    %11 = vector.load %arg5[%c0_8, %c0_9] : memref<128x128xf32, #tpu.memory_space<vmem>>, vector<128x128xf32>
    %cst_10 = arith.constant dense<0.000000e+00> : vector<128x128xf32>
    %12 = tpu.matmul %10, %11, %cst_10 {dimension_numbers = #tpu.dot_dimension_numbers<[1], [0], [0], [1], [0, 0, 1, 1], [], []>} : vector<128x128xf32>, vector<128x128xf32>, vector<128x128xf32> -> vector<128x128xf32>
    %13 = arith.addf %12, %7 : vector<128x128xf32>
    %14 = arith.addf %13, %9 : vector<128x128xf32>
    %c0_11 = arith.constant 0 : index
    %c0_12 = arith.constant 0 : index
    %15 = vector.load %arg6[%c0_11, %c0_12] : memref<1x128xf32, #tpu.memory_space<vmem>>, vector<1x128xf32>
    %16 = vector.broadcast %15 : vector<1x128xf32> to vector<128x128xf32>
    %17 = arith.addf %14, %16 : vector<128x128xf32>
    %c0_13 = arith.constant 0 : index
    %c0_14 = arith.constant 0 : index
    %18 = vector.load %arg7[%c0_13, %c0_14] : memref<128x128xf32, #tpu.memory_space<vmem>>, vector<128x128xf32>
    tpu.vector_store %arg7[%c0_13, %c0_14], %17 {strides = array<i32>} : memref<128x128xf32, #tpu.memory_space<vmem>>, vector<128x128xf32>,
    return
  }
  func.func @transform_0(%arg0: i32) -> (i32, i32) {
    %c0_i32 = arith.constant 0 : i32
    %c0_i32_0 = arith.constant 0 : i32
    return %arg0, %c0_i32 : i32, i32
  }
  func.func @transform_1(%arg0: i32) -> (i32, i32) {
    %c0_i32 = arith.constant 0 : i32
    %c0_i32_0 = arith.constant 0 : i32
    return %arg0, %c0_i32 : i32, i32
  }
  func.func @transform_2(%arg0: i32) -> (i32, i32) {
    %c0_i32 = arith.constant 0 : i32
    %c0_i32_0 = arith.constant 0 : i32
    %c0_i32_1 = arith.constant 0 : i32
    return %c0_i32, %c0_i32_0 : i32, i32
  }
  func.func @transform_3(%arg0: i32) -> (i32, i32) {
    %c0_i32 = arith.constant 0 : i32
    %c0_i32_0 = arith.constant 0 : i32
    %c0_i32_1 = arith.constant 0 : i32
    return %c0_i32, %c0_i32_0 : i32, i32
  }
  func.func @transform_4(%arg0: i32) -> (i32, i32) {
    %c0_i32 = arith.constant 0 : i32
    %c0_i32_0 = arith.constant 0 : i32
    %c0_i32_1 = arith.constant 0 : i32
    return %c0_i32, %c0_i32_0 : i32, i32
  }
  func.func @transform_5(%arg0: i32) -> (i32, i32) {
    %c0_i32 = arith.constant 0 : i32
    %c0_i32_0 = arith.constant 0 : i32
    %c0_i32_1 = arith.constant 0 : i32
    return %c0_i32, %c0_i32_0 : i32, i32
  }
  func.func @transform_6(%arg0: i32) -> (i32, i32) {
    %c0_i32 = arith.constant 0 : i32
    %c0_i32_0 = arith.constant 0 : i32
    return %arg0, %c0_i32 : i32, i32
  }
}

module attributes {stable_mosaic.version = 11 : i64} {
  func.func @_biaffine_kernel(%arg0: i32, %arg1: memref<128x32xf32, #tpu.memory_space<vmem>>, %arg2: memref<128x32xf32, #tpu.memory_space<vmem>>, %arg3: memref<32x256xf32, #tpu.memory_space<vmem>>, %arg4: memref<32x256xf32, #tpu.memory_space<vmem>>, %arg5: memref<128x128xf32, #tpu.memory_space<vmem>>, %arg6: memref<1x128xf32, #tpu.memory_space<vmem>>, %arg7: memref<128x128xf32, #tpu.memory_space<vmem>>) attributes {dimension_semantics = [#tpu.dimension_semantics<parallel>], iteration_bounds = array<i64: 2>, scalar_prefetch = 0 : i64, scratch_operands = 0 : i64, tpu.core_type = #tpu.core_type<tc>, window_params = [{transform_indices = @transform_0, window_bounds = array<i64: 128, 32>}, {transform_indices = @transform_1, window_bounds = array<i64: 128, 32>}, {pipeline_mode = #tpu.pipeline_mode<synchronous>, transform_indices = @transform_2, window_bounds = array<i64: 32, 256>}, {pipeline_mode = #tpu.pipeline_mode<synchronous>, transform_indices = @transform_3, window_bounds = array<i64: 32, 256>}, {pipeline_mode = #tpu.pipeline_mode<synchronous>, transform_indices = @transform_4, window_bounds = array<i64: 128, 128>}, {pipeline_mode = #tpu.pipeline_mode<synchronous>, transform_indices = @transform_5, window_bounds = array<i64: 1, 128>}, {transform_indices = @transform_6, window_bounds = array<i64: 128, 128>}]} {
    %c0 = arith.constant 0 : index
    %c0_0 = arith.constant 0 : index
    %0 = vector.load %arg1[%c0, %c0_0] : memref<128x32xf32, #tpu.memory_space<vmem>>, vector<128x32xf32>
    %c0_1 = arith.constant 0 : index
    %c0_2 = arith.constant 0 : index
    %1 = vector.load %arg2[%c0_1, %c0_2] : memref<128x32xf32, #tpu.memory_space<vmem>>, vector<128x32xf32>
    %c0_3 = arith.constant 0 : index
    %c0_4 = arith.constant 0 : index
    %2 = vector.load %arg3[%c0_3, %c0_4] : memref<32x256xf32, #tpu.memory_space<vmem>>, vector<32x256xf32>
    %cst = arith.constant dense<0.000000e+00> : vector<128x256xf32>
    %3 = tpu.matmul %0, %2, %cst {dimension_numbers = #tpu.dot_dimension_numbers<[1], [0], [0], [1], [0, 0, 1, 1], [], []>} : vector<128x32xf32>, vector<32x256xf32>, vector<128x256xf32> -> vector<128x256xf32>
    %c0_5 = arith.constant 0 : index
    %c0_6 = arith.constant 0 : index
    %4 = vector.load %arg4[%c0_5, %c0_6] : memref<32x256xf32, #tpu.memory_space<vmem>>, vector<32x256xf32>
    %cst_7 = arith.constant dense<0.000000e+00> : vector<128x256xf32>
    %5 = tpu.matmul %1, %4, %cst_7 {dimension_numbers = #tpu.dot_dimension_numbers<[1], [0], [0], [1], [0, 0, 1, 1], [], []>} : vector<128x32xf32>, vector<32x256xf32>, vector<128x256xf32> -> vector<128x256xf32>
    %6 = vector.extract_strided_slice %3 {offsets = [0, 0], sizes = [128, 128], strides = [1, 1]} : vector<128x256xf32> to vector<128x128xf32>
    %7 = vector.extract_strided_slice %3 {offsets = [0, 128], sizes = [128, 128], strides = [1, 1]} : vector<128x256xf32> to vector<128x128xf32>
    %8 = vector.extract_strided_slice %5 {offsets = [0, 0], sizes = [128, 128], strides = [1, 1]} : vector<128x256xf32> to vector<128x128xf32>
    %9 = vector.extract_strided_slice %5 {offsets = [0, 128], sizes = [128, 128], strides = [1, 1]} : vector<128x256xf32> to vector<128x128xf32>
    %10 = arith.mulf %6, %8 : vector<128x128xf32>
    %c0_8 = arith.constant 0 : index
    %c0_9 = arith.constant 0 : index
    %11 = vector.load %arg5[%c0_8, %c0_9] : memref<128x128xf32, #tpu.memory_space<vmem>>, vector<128x128xf32>
    %cst_10 = arith.constant dense<0.000000e+00> : vector<128x128xf32>
    %12 = tpu.matmul %10, %11, %cst_10 {dimension_numbers = #tpu.dot_dimension_numbers<[1], [0], [0], [1], [0, 0, 1, 1], [], []>} : vector<128x128xf32>, vector<128x128xf32>, vector<128x128xf32> -> vector<128x128xf32>
    %13 = arith.addf %12, %7 : vector<128x128xf32>
    %14 = arith.addf %13, %9 : vector<128x128xf32>
    %c0_11 = arith.constant 0 : index
    %c0_12 = arith.constant 0 : index
    %15 = vector.load %arg6[%c0_11, %c0_12] : memref<1x128xf32, #tpu.memory_space<vmem>>, vector<1x128xf32>
    %16 = vector.broadcast %15 : vector<1x128xf32> to vector<128x128xf32>
    %17 = arith.addf %14, %16 : vector<128x128xf32>
    %c0_13 = arith.constant 0 : index
    %c0_14 = arith.constant 0 : index
    %18 = vector.load %arg7[%c0_13, %c0_14] : memref<128x128xf32, #tpu.memory_space<vmem>>, vector<128x128xf32>
    tpu.vector_store %arg7[%c0_13, %c0_14], %17 {strides = array<i32>} : memref<128x128xf32, #tpu.memory_space<vmem>>, vector<128x128xf32>,
    return
  }
  func.func @transform_0(%arg0: i32) -> (i32, i32) {
    %c0_i32 = arith.constant 0 : i32
    %c0_i32_0 = arith.constant 0 : i32
    return %arg0, %c0_i32 : i32, i32
  }
  func.func @transform_1(%arg0: i32) -> (i32, i32) {
    %c0_i32 = arith.constant 0 : i32
    %c0_i32_0 = arith.constant 0 : i32
    return %arg0, %c0_i32 : i32, i32
  }
  func.func @transform_2(%arg0: i32) -> (i32, i32) {
    %c0_i32 = arith.constant 0 : i32
    %c0_i32_0 = arith.constant 0 : i32
    %c0_i32_1 = arith.constant 0 : i32
    return %c0_i32, %c0_i32_0 : i32, i32
  }
  func.func @transform_3(%arg0: i32) -> (i32, i32) {
    %c0_i32 = arith.constant 0 : i32
    %c0_i32_0 = arith.constant 0 : i32
    %c0_i32_1 = arith.constant 0 : i32
    return %c0_i32, %c0_i32_0 : i32, i32
  }
  func.func @transform_4(%arg0: i32) -> (i32, i32) {
    %c0_i32 = arith.constant 0 : i32
    %c0_i32_0 = arith.constant 0 : i32
    %c0_i32_1 = arith.constant 0 : i32
    return %c0_i32, %c0_i32_0 : i32, i32
  }
  func.func @transform_5(%arg0: i32) -> (i32, i32) {
    %c0_i32 = arith.constant 0 : i32
    %c0_i32_0 = arith.constant 0 : i32
    %c0_i32_1 = arith.constant 0 : i32
    return %c0_i32, %c0_i32_0 : i32, i32
  }
  func.func @transform_6(%arg0: i32) -> (i32, i32) {
    %c0_i32 = arith.constant 0 : i32
    %c0_i32_0 = arith.constant 0 : i32
    return %arg0, %c0_i32 : i32, i32
  }
}

</mosaic_0001>

<bundles_post_ra>
// kernel: tpu_custom_call.1
= control target key start
LH: loop header
LB: loop body
LE: loop exit
PB: predicated region body
PF: predicated region fallthrough
CT: control target
= control target key end

     0   :  { %11 = vsyncpa [#allocation3], 0  ;;  %s1855_s0 = inlined_call_operand.vmem [shape: f32[256,32], index: 0, kind: input, shape index: {}]   ;;  %s1856_s1 = inlined_call_operand.vmem [shape: f32[256,32], index: 1, kind: input, shape index: {}]   ;;  %s1857_s2 = inlined_call_operand.vmem [shape: f32[32,256], index: 2, kind: input, shape index: {}]   ;;  %s1858_s3 = inlined_call_operand.vmem [shape: f32[32,256], index: 3, kind: input, shape index: {}]   ;;  %s1859_s4 = inlined_call_operand.vmem [shape: f32[128,128], index: 4, kind: input, shape index: {}]   ;;  %s1860_s5 = inlined_call_operand.vmem [shape: f32[1,128], index: 5, kind: input, shape index: {}]   ;;  %s1861_s6 = inlined_call_operand.hbm [shape: f32[256,128], index: 6, kind: output, shape index: {}]  }
   0x1   :  { %13 = vsyncpa [#allocation3 + $0x1], 0  ;;  %s1395_s21 = smov 0   ;;  %s1397_s22 = smov 0  }
   0x2   :  { %s1399_s23 = smov 0   ;;  %s1401_s24 = smov 0  }
   0x3 LB: > { %s1416_s25 = sadd.s32 4294967295, %s1354_s24   ;;  %s1062_s26 = sadd.s32 4294967294, %s1354_s24   ;;  %s1354_s24 = sphi %s1401_s24, %s1867_s24   ;;  %s1350_s23 = sphi %s1399_s23, %s1866_s23   ;;  %s1346_s22 = sphi %s1397_s22, %s1865_s22   ;;  %s1342_s21 = sphi %s1395_s21, %s1864_s21  }
   0x4   : > { %s1420_s27 = sadd.s32 1, %s1354_s24   ;;  %s162_s28 = sadd.s32 1, %s1350_s23 }
   0x5   : > { %s159_s29 = ssub.s32 %s1354_s24, %s1420_s27  ;;  %p172_p0 = scmp.ne.s32.totalorder %s1350_s23, %s1346_s22 }
   0x6   : > { %p160_p1 = scmp.eq.s32.totalorder %s159_s29, 0  ;;  %p173_p2 = scmp.eq.s32.totalorder %s1416_s25, 1 }
   0x7   : > { %p178_p3 = scmp.ne.s32.totalorder %s1346_s22, %s1342_s21  ;;  %p179_p4 = scmp.eq.s32.totalorder %s1062_s26, 1 }
   0x8   : > { %s1431_s30 = scalar_select %p160_p1, %s1350_s23, %s162_s28  }
   0x9   : > { %p1433_p5 = por %p173_p2, %p172_p0  ;;  %p1437_p6 = por %p179_p4, %p178_p3 }
   0xa   : > { %p1065_p7 = scmp.ge.s32.totalorder %s1354_s24, 1  ;;  %p227_p8 = scmp.lt.s32.totalorder %s1354_s24, 3 }
   0xc   : > { %p228_p9 = pnand %p1065_p7, %p227_p8 }
   0xd   : > { %v308_v0 = vld [vmem:[%s1857_s2 + $0x8] sm:$0xff] (!%p228_p9)  ;;  %v310_v1 = vld [vmem:[%s1857_s2 + $0x18] sm:$0xff] (!%p228_p9)  ;;  %v307_v2 = vld [vmem:[%s1857_s2] sm:$0xff] (!%p228_p9)  ;;  %s1067_s15 = sshll.u32 (!%p228_p9), %s1416_s25, 4  ;;  %v1356_v7 = vmov (!%p228_p9), 0.0   ;;  %vm315_vm0 = vcmask (!%p228_p9), 261120  }
   0xe   : > { %231 = sbr.rel (%p228_p9) target bundleno = 549 (0x225), region = 44  ;;  %v1198_v3 = vpack.c.bf16 (!%p228_p9), %v310_v1, %v308_v0  ;;  %v309_v4 = vld [vmem:[%s1857_s2 + $0x10] sm:$0xff] (!%p228_p9)  ;;  %v312_v5 = vld [vmem:[%s1857_s2 + $0x28] sm:$0xff] (!%p228_p9)  ;;  %v314_v6 = vld [vmem:[%s1857_s2 + $0x38] sm:$0xff] (!%p228_p9)  ;;  %500 = vmatprep.mubr.f32.mxu1 (!%p228_p9), %v1356_v7  ;;  %p263_p10 = scmp.lt.s32.totalorder (!%p228_p9), %s1067_s15, 31  ;;  %428 = vmatprep.mubr.f32.mxu0 (!%p228_p9), %v1356_v7 }
   0xf   : > { %v1200_v8 = vpack.c.bf16 (!%p228_p9), %v309_v4, %v307_v2  ;;  %v1202_v9 = vpack.c.bf16 (!%p228_p9), %v314_v6, %v312_v5  ;;  %v311_v10 = vld [vmem:[%s1857_s2 + $0x20] sm:$0xff] (!%p228_p9)  ;;  %v313_v11 = vld [vmem:[%s1857_s2 + $0x30] sm:$0xff] (!%p228_p9)  ;;  %v526_v12 = vld [vmem:[%s1858_s3 + $0x8] sm:$0xff] (!%p228_p9)  ;;  %s259_s9 = sand.u32 (!%p228_p9), 1, %s1346_s22   ;;  %s1109_s16 = sshll.u32 (!%p228_p9), %s1416_s25, 11 }
  0x10   : > { %1246 = vmatprep.subr.bf16.mxu1 (!%p228_p9), %v1198_v3  ;;  %v528_v13 = vld [vmem:[%s1858_s3 + $0x18] sm:$0xff] (!%p228_p9)  ;;  %1199 = vmatprep.subr.bf16.mxu0 (!%p228_p9), %v1198_v3  ;;  %v1204_v14 = vpack.c.bf16 (!%p228_p9), %v313_v11, %v311_v10  ;;  %v525_v15 = vld [vmem:[%s1858_s3] sm:$0xff] (!%p228_p9)  ;;  %v527_v17 = vld [vmem:[%s1858_s3 + $0x10] sm:$0xff] (!%p228_p9)  ;;  %s1066_s10 = sshll.u32 (!%p228_p9), %s259_s9, 7  ;;  %s1814_s25 = scalar_lea.sflag (!%p228_p9), [#allocation3], %s259_s9 }
  0x11   : > { %1248 = vmatpush1.bf16.msra.mxu1 (!%p228_p9), %v1200_v8  ;;  %1201 = vmatpush1.bf16.msra.mxu0 (!%p228_p9), %v1200_v8  ;;  %v1206_v16 = vpack.c.bf16 (!%p228_p9), %v528_v13, %v526_v12  ;;  %v758_v18 = vld [vmem:[%s1859_s4] sm:$0xff] (!%p228_p9)  ;;  %v759_v19 = vld [vmem:[%s1859_s4 + $0x8] sm:$0xff] (!%p228_p9)  ;;  %v532_v21 = vld [vmem:[%s1858_s3 + $0x38] sm:$0xff] (!%p228_p9)  ;;  %v1208_v24 = vpack.c.bf16 (!%p228_p9), %v527_v17, %v525_v15  ;;  %s1743_s14 = scalar_lea.vmem (!%p228_p9), [#allocation2], %s1066_s10 }
  0x12   : > { %1247 = vmatprep.subr.bf16.mxu1 (!%p228_p9), %v1202_v9  ;;  %1203 = vmatprep.subr.bf16.mxu0 (!%p228_p9), %v1202_v9  ;;  %v530_v20 = vld [vmem:[%s1858_s3 + $0x28] sm:$0xff] (!%p228_p9)  ;;  %v1214_v22 = vpack.c.bf16 (!%p228_p9), %v759_v19, %v758_v18  ;;  %v529_v27 = vld [vmem:[%s1858_s3 + $0x20] sm:$0xff] (!%p228_p9)  ;;  %v531_v28 = vld [vmem:[%s1858_s3 + $0x30] sm:$0xff] (!%p228_p9)  ;;  %s988_s17 = sshll.u32 (!%p228_p9), %s1743_s14, 4  ;;  %s1807_s17 = int_to_ptr.vmem [resolvable:$true] %s988_s17 }
  0x13   : > { %v1210_v26 = vpack.c.bf16 (!%p228_p9), %v532_v21, %v530_v20  ;;  %v760_v29 = vld [vmem:[%s1859_s4 + $0x10] sm:$0xff] (!%p228_p9)  ;;  %v761_v30 = vld [vmem:[%s1859_s4 + $0x18] sm:$0xff] (!%p228_p9)  ;;  %v1212_v32 = vpack.c.bf16 (!%p228_p9), %v531_v28, %v529_v27  ;;  %v762_v35 = vld [vmem:[%s1859_s4 + $0x20] sm:$0xff] (!%p228_p9) }
  0x14   : > { %v1218_v34 = vpack.c.bf16 (!%p228_p9), %v761_v30, %v760_v29  ;;  %v763_v38 = vld [vmem:[%s1859_s4 + $0x28] sm:$0xff] (!%p228_p9)  ;;  %v764_v2 = vld [vmem:[%s1859_s4 + $0x30] sm:$0xff] (!%p228_p9)  ;;  %v765_v3 = vld [vmem:[%s1859_s4 + $0x38] sm:$0xff] (!%p228_p9) }
  0x15   : > { %s1869_s15 = smov (!%p263_p10, %s1067_s15), 31  ;;  %1249 = vmatpush1.bf16.msra.mxu1 %v1204_v14  ;;  %1205 = vmatpush1.bf16.msra.mxu0 %v1204_v14  ;;  %v1222_v39 = vpack.c.bf16 %v763_v38, %v762_v35  ;;  %v1226_v4 = vpack.c.bf16 %v765_v3, %v764_v2  ;;  %v766_v5 = vld [vmem:[%s1859_s4 + $0x40] sm:$0xff]  ;;  %v767_v6 = vld [vmem:[%s1859_s4 + $0x48] sm:$0xff]  ;;  %v768_v8 = vld [vmem:[%s1859_s4 + $0x50] sm:$0xff] }
  0x16   : > { %s1068_s18 = sshll.u32 %s1869_s15, 3  ;;  %1207 = vmatprep.subr.bf16.mxu1 %v1206_v16  ;;  %1215 = vmatprep.subr.bf16.mxu0 %v1214_v22  ;;  %v769_v9 = vld [vmem:[%s1859_s4 + $0x58] sm:$0xff]  ;;  %v770_v11 = vld [vmem:[%s1859_s4 + $0x60] sm:$0xff]  ;;  %v771_v12 = vld [vmem:[%s1859_s4 + $0x68] sm:$0xff]  ;;  %s1292_s15 = scalar_lea.vmem %s1807_s17, 2048 }
  0x17   : > { %s1496_s12 = scalar_lea.vmem %s1855_s0, %s1068_s18  ;;  %s1547_s26 = scalar_lea.vmem %s1856_s1, %s1068_s18  ;;  %v1234_v10 = vpack.c.bf16 %v769_v9, %v768_v8  ;;  %v1238_v13 = vpack.c.bf16 %v771_v12, %v770_v11  ;;  %v772_v14 = vld [vmem:[%s1859_s4 + $0x70] sm:$0xff]  ;;  %v773_v15 = vld [vmem:[%s1859_s4 + $0x78] sm:$0xff] }
  0x18   : > { %v287_v23 = vld [vmem:[%s1496_s12 + $0x60] sm:$0xff]  ;;  %v288_v31 = vld [vmem:[%s1496_s12 + $0x68] sm:$0xff]  ;;  %v289_v36 = vld [vmem:[%s1496_s12 + $0x70] sm:$0xff]  ;;  %v1242_v16 = vpack.c.bf16 %v773_v15, %v772_v14  ;;  %p1293_p11 = scmp.ne.s32.totalorder %s1807_s17, %s1292_s15  ;;  %s1357_s18 = smov [#allocation2]  }
  0x19   : > { %v275_v25 = vld [vmem:[%s1496_s12] sm:$0xff]  ;;  %1083 = vmatmul.mubr.msk.f32.vlgmr.msra.gmra.mrb[0].mxu1 %vm315_vm0, %v287_v23  ;;  %v276_v33 = vld [vmem:[%s1496_s12 + $0x8] sm:$0xff]  ;;  %v277_v37 = vld [vmem:[%s1496_s12 + $0x10] sm:$0xff] }
  0x1a   : > { %1071 = vmatmul.mubr.msk.f32.vlgmr.msra.gmra.mrb[0].mxu0 %vm315_vm0, %v275_v25  ;;  %1209 = vmatpush1.bf16.msra.mxu1 %v1208_v24  ;;  %v290_v40 = vld [vmem:[%s1496_s12 + $0x78] sm:$0xff]  ;;  %v291_v42 = vld [vmem:[%s1547_s26] sm:$0xff]  ;;  %v292_v44 = vld [vmem:[%s1547_s26 + $0x8] sm:$0xff]  ;;  %p1294_p12 = pnand %p1293_p11, %p1433_p5 }
  0x1b   : > { %506 = vmatprep.mubr.f32.mxu1 %v1356_v7  ;;  %1211 = vmatprep.subr.bf16.mxu1 %v1210_v26  ;;  %v278_v41 = vld [vmem:[%s1496_s12 + $0x18] sm:$0xff]  ;;  %v279_v43 = vld [vmem:[%s1496_s12 + $0x20] sm:$0xff]  ;;  %v280_v45 = vld [vmem:[%s1496_s12 + $0x28] sm:$0xff] }
  0x1c   : > { %434 = vmatprep.mubr.f32.mxu0 %v1356_v7  ;;  %1217 = vmatpush3.bf16.msra.mxu0 %v1214_v22  ;;  %v293_v46 = vld [vmem:[%s1547_s26 + $0x10] sm:$0xff]  ;;  %v294_v48 = vld [vmem:[%s1547_s26 + $0x18] sm:$0xff]  ;;  %v295_v50 = vld [vmem:[%s1547_s26 + $0x20] sm:$0xff]  ;;  %p1295_p13 = pneg %p1294_p12 }
  0x1d   : > { %1084 = vmatmul.mubr.msk.f32.gmra.mrb[2].mxu1 %vm315_vm0, %v288_v31  ;;  %1219 = vmatprep.subr.bf16.mxu0 %v1218_v34  ;;  %v281_v47 = vld [vmem:[%s1496_s12 + $0x30] sm:$0xff]  ;;  %v282_v49 = vld [vmem:[%s1496_s12 + $0x38] sm:$0xff]  ;;  %v283_v51 = vld [vmem:[%s1496_s12 + $0x40] sm:$0xff] }
  0x1e   : > { %1072 = vmatmul.mubr.msk.f32.gmra.mrb[2].mxu0 %vm315_vm0, %v276_v33  ;;  %512 = vmatprep.mubr.f32.mxu1 %v1356_v7  ;;  %v296_v52 = vld [vmem:[%s1547_s26 + $0x28] sm:$0xff]  ;;  %v297_v54 = vld [vmem:[%s1547_s26 + $0x30] sm:$0xff]  ;;  %v298_v56 = vld [vmem:[%s1547_s26 + $0x38] sm:$0xff] }
  0x1f   : > { %1213 = vmatpush1.bf16.msra.mxu1 %v1212_v32  ;;  %440 = vmatprep.mubr.f32.mxu0 %v1356_v7  ;;  %v284_v53 = vld [vmem:[%s1496_s12 + $0x48] sm:$0xff]  ;;  %v285_v55 = vld [vmem:[%s1496_s12 + $0x50] sm:$0xff]  ;;  %v286_v57 = vld [vmem:[%s1496_s12 + $0x58] sm:$0xff]  ;;  %s1296_s12 = sshll.u32 %s1357_s18, 4  ;;  %s1297_s12 = int_to_ptr.vmem [resolvable:$false] %s1296_s12 }
  0x20   : > { %1221 = vmatpush3.bf16.msra.mxu0 %v1218_v34  ;;  %v299_v58 = vld [vmem:[%s1547_s26 + $0x40] sm:$0xff]  ;;  %v300_v59 = vld [vmem:[%s1547_s26 + $0x48] sm:$0xff]  ;;  %v301_v60 = vld [vmem:[%s1547_s26 + $0x50] sm:$0xff]  ;;  %s1298_s28 = scalar_lea.vmem %s1297_s12, 4096  ;;  %p1299_p0 = scmp.lt.s32.totalorder %s1807_s17, %s1297_s12 }
  0x21   : > { %1085 = vmatmul.mubr.msk.f32.gmra.mrb[4].mxu1 %vm315_vm0, %v289_v36  ;;  %1223 = vmatprep.subr.bf16.mxu0 %v1222_v39  ;;  %v302_v61 = vld [vmem:[%s1547_s26 + $0x58] sm:$0xff]  ;;  %v303_v62 = vld [vmem:[%s1547_s26 + $0x60] sm:$0xff]  ;;  %v304_v63 = vld [vmem:[%s1547_s26 + $0x68] sm:$0xff]  ;;  %p1300_p1 = scmp.lt.s32.totalorder %s1298_s28, %s1292_s15 }
  0x22   : > { %1073 = vmatmul.mubr.msk.f32.gmra.mrb[4].mxu0 %vm315_vm0, %v277_v37  ;;  %518 = vmatprep.mubr.f32.mxu1 %v1356_v7  ;;  %v305_v0 = vld [vmem:[%s1547_s26 + $0x70] sm:$0xff]  ;;  %v306_v1 = vld [vmem:[%s1547_s26 + $0x78] sm:$0xff]  ;;  %s1805_s26 = scalar_lea.hbm %s1861_s6, %s1109_s16 }
  0x23   : > { %446 = vmatprep.mubr.f32.mxu0 %v1356_v7  ;;  %p1301_p2 = por %p1300_p1, %p1299_p0 }
  0x24   : > { %1225 = vmatpush3.bf16.msra.mxu0 %v1222_v39 }
  0x25   : > { %1086 = vmatmul.mubr.msk.f32.gmra.mrb[6].mxu1 %vm315_vm0, %v290_v40  ;;  %1227 = vmatprep.subr.bf16.mxu0 %v1226_v4  ;;  %p1302_p3 = pnand %p1301_p2, %p1295_p13 }
  0x26   : > { %1074 = vmatmul.mubr.msk.f32.gmra.mrb[6].mxu0 %vm315_vm0, %v278_v41  ;;  %645 = vmatprep.mubr.f32.mxu1 %v1356_v7 }
  0x27   : > { %452 = vmatprep.mubr.f32.mxu0 %v1356_v7 }
  0x28   : > { %1229 = vmatpush3.bf16.msra.mxu0 %v1226_v4 }
  0x29   : > { %1087 = vmatmul.mubr.msk.f32.vlgmr.msra.gmra.mrb[8].mxu1 %vm315_vm0, %v291_v42 }
  0x2a   : > { %1075 = vmatmul.mubr.msk.f32.gmra.mrb[8].mxu0 %vm315_vm0, %v279_v43  ;;  %651 = vmatprep.mubr.f32.mxu1 %v1356_v7 }
  0x2b   : > { %458 = vmatprep.mubr.f32.mxu0 %v1356_v7 }
  0x2d   : > { %1088 = vmatmul.mubr.msk.f32.gmra.mrb[10].mxu1 %vm315_vm0, %v292_v44 }
  0x2e   : > { %1076 = vmatmul.mubr.msk.f32.gmra.mrb[10].mxu0 %vm315_vm0, %v280_v45  ;;  %657 = vmatprep.mubr.f32.mxu1 %v1356_v7 }
  0x2f   : > { %464 = vmatprep.mubr.f32.mxu0 %v1356_v7 }
  0x31   : > { %1089 = vmatmul.mubr.msk.f32.gmra.mrb[12].mxu1 %vm315_vm0, %v293_v46 }
  0x32   : > { %1077 = vmatmul.mubr.msk.f32.gmra.mrb[12].mxu0 %vm315_vm0, %v281_v47  ;;  %663 = vmatprep.mubr.f32.mxu1 %v1356_v7 }
  0x33   : > { %470 = vmatprep.mubr.f32.mxu0 %v1356_v7 }
  0x35   : > { %1090 = vmatmul.mubr.msk.f32.gmra.mrb[14].mxu1 %vm315_vm0, %v294_v48 }
  0x36   : > { %1078 = vmatmul.mubr.msk.f32.gmra.mrb[14].mxu0 %vm315_vm0, %v282_v49  ;;  %669 = vmatprep.mubr.f32.mxu1 %v1356_v7 }
  0x37   : > { %476 = vmatprep.mubr.f32.mxu0 %v1356_v7 }
  0x39   : > { %1091 = vmatmul.mubr.msk.f32.gmra.mrb[16].mxu1 %vm315_vm0, %v295_v50 }
  0x3a   : > { %1079 = vmatmul.mubr.msk.f32.gmra.mrb[16].mxu0 %vm315_vm0, %v283_v51  ;;  %675 = vmatprep.mubr.f32.mxu1 %v1356_v7 }
  0x3b   : > { %482 = vmatprep.mubr.f32.mxu0 %v1356_v7 }
  0x3d   : > { %1092 = vmatmul.mubr.msk.f32.gmra.mrb[18].mxu1 %vm315_vm0, %v296_v52 }
  0x3e   : > { %1080 = vmatmul.mubr.msk.f32.gmra.mrb[18].mxu0 %vm315_vm0, %v284_v53  ;;  %681 = vmatprep.mubr.f32.mxu1 %v1356_v7 }
  0x3f   : > { %488 = vmatprep.mubr.f32.mxu0 %v1356_v7 }
  0x41   : > { %1093 = vmatmul.mubr.msk.f32.gmra.mrb[20].mxu1 %vm315_vm0, %v297_v54 }
  0x42   : > { %1081 = vmatmul.mubr.msk.f32.gmra.mrb[20].mxu0 %vm315_vm0, %v285_v55  ;;  %687 = vmatprep.mubr.f32.mxu1 %v1356_v7 }
  0x43   : > { %494 = vmatprep.mubr.f32.mxu0 %v1356_v7 }
  0x45   : > { %1094 = vmatmul.mubr.msk.f32.gmra.mrb[22].mxu1 %vm315_vm0, %v298_v56 }
  0x46   : > { %1082 = vmatmul.mubr.msk.f32.gmra.mrb[22].mxu0 %vm315_vm0, %v286_v57  ;;  %693 = vmatprep.mubr.f32.mxu1 %v1356_v7 }
  0x49   : > { %1095 = vmatmul.mubr.msk.f32.gmra.mrb[24].mxu1 %vm315_vm0, %v299_v58 }
  0x4a   : > { %699 = vmatprep.mubr.f32.mxu1 %v1356_v7 }
  0x4d   : > { %1096 = vmatmul.mubr.msk.f32.gmra.mrb[26].mxu1 %vm315_vm0, %v300_v59 }
  0x4e   : > { %705 = vmatprep.mubr.f32.mxu1 %v1356_v7 }
  0x51   : > { %1097 = vmatmul.mubr.msk.f32.gmra.mrb[28].mxu1 %vm315_vm0, %v301_v60 }
  0x52   : > { %711 = vmatprep.mubr.f32.mxu1 %v1356_v7 }
  0x55   : > { %1098 = vmatmul.mubr.msk.f32.gmra.mrb[30].mxu1 %vm315_vm0, %v302_v61 }
  0x56   : > { %717 = vmatprep.mubr.f32.mxu1 %v1356_v7 }
  0x59   : > { %1099 = vmatmul.mubr.msk.f32.gmra.mrb[32].mxu1 %vm315_vm0, %v303_v62 }
  0x5a   : > { %723 = vmatprep.mubr.f32.mxu1 %v1356_v7 }
  0x5d   : > { %1100 = vmatmul.mubr.msk.f32.gmra.mrb[34].mxu1 %vm315_vm0, %v304_v63 }
  0x5e   : > { %729 = vmatprep.mubr.f32.mxu1 %v1356_v7 }
  0x61   : > { %1101 = vmatmul.mubr.msk.f32.gmra.mrb[36].mxu1 %vm315_vm0, %v305_v0 }
  0x62   : > { %735 = vmatprep.mubr.f32.mxu1 %v1356_v7  ;;  %v1230_v7 = vpack.c.bf16 %v767_v6, %v766_v5 }
  0x64   : > { %1231 = vmatprep.subr.bf16.mxu0 %v1230_v7 }
  0x65   : > { %1102 = vmatmul.mubr.msk.f32.gmra.mrb[38].mxu1 %vm315_vm0, %v306_v1  ;;  %1233 = vmatpush3.bf16.msra.mxu0 %v1230_v7 }
  0x66   : > { %1235 = vmatprep.subr.bf16.mxu0 %v1234_v10 }
  0x69   : > { %1237 = vmatpush3.bf16.msra.mxu0 %v1234_v10 }
  0x6a   : > { %1239 = vmatprep.subr.bf16.mxu0 %v1238_v13 }
  0x6d   : > { %1241 = vmatpush3.bf16.msra.mxu0 %v1238_v13 }
  0x6e   : > { %1243 = vmatprep.subr.bf16.mxu0 %v1242_v16 }
  0x71   : > { %1245 = vmatpush3.bf16.msra.mxu0 %v1242_v16 }
  0xec   : > { %v1653_v17 = vpop.f32.mrb[0].mxu1 }
  0xed   : > { %v430_v18 = vpop.f32.mrb[0].mxu0  ;;  %v1655_v19 = vpop.f32.mrb[1].mxu1 }
  0xee   : > { %v1657_v20 = vpop.f32.mrb[1].mxu0 }
  0xf0   : > { %v1659_v21 = vpop.f32.mrb[2].mxu1 }
  0xf1   : > { %v436_v22 = vpop.f32.mrb[2].mxu0  ;;  %v1661_v23 = vpop.f32.mrb[3].mxu1 }
  0xf2   : > { %v1663_v24 = vpop.f32.mrb[3].mxu0 }
  0xf4   : > { %v1665_v25 = vpop.f32.mrb[4].mxu1 }
  0xf5   : > { %v442_v26 = vpop.f32.mrb[4].mxu0  ;;  %v1667_v27 = vpop.f32.mrb[5].mxu1 }
  0xf6   : > { %v1669_v28 = vpop.f32.mrb[5].mxu0 }
  0xf8   : > { %v1671_v29 = vpop.f32.mrb[6].mxu1 }
  0xf9   : > { %v448_v30 = vpop.f32.mrb[6].mxu0  ;;  %v1673_v31 = vpop.f32.mrb[7].mxu1 }
  0xfa   : > { %v1675_v32 = vpop.f32.mrb[7].mxu0 }
  0xfc   : > { %v647_v33 = vpop.f32.mrb[8].mxu1 }
  0xfd   : > { %v454_v34 = vpop.f32.mrb[8].mxu0  ;;  %v742_v35 = vmul.f32 %v647_v33, %v430_v18  ;;  %v1677_v36 = vpop.f32.mrb[9].mxu1 }
  0xfe   : > { %v1679_v37 = vpop.f32.mrb[9].mxu0 }
  0xff   : > { %1174 = vmatprep.mubr.f32.mxu0 %v742_v35 }
 0x100   : > { %v653_v38 = vpop.f32.mrb[10].mxu1 }
 0x101   : > { %v460_v39 = vpop.f32.mrb[10].mxu0  ;;  %v743_v40 = vmul.f32 %v653_v38, %v436_v22  ;;  %v1681_v41 = vpop.f32.mrb[11].mxu1 }
 0x102   : > { %v1683_v42 = vpop.f32.mrb[11].mxu0 }
 0x103   : > { %1175 = vmatmul.mubr.f32.vlgmr.msra.gmra.mrb[24].mxu0 %v743_v40 }
 0x104   : > { %v659_v43 = vpop.f32.mrb[12].mxu1 }
 0x105   : > { %v466_v44 = vpop.f32.mrb[12].mxu0  ;;  %v744_v45 = vmul.f32 %v659_v43, %v442_v26  ;;  %v1685_v46 = vpop.f32.mrb[13].mxu1 }
 0x106   : > { %v1687_v47 = vpop.f32.mrb[13].mxu0 }
 0x107   : > { %1177 = vmatprep.mubr.f32.mxu0 %v744_v45 }
 0x108   : > { %v665_v48 = vpop.f32.mrb[14].mxu1 }
 0x109   : > { %v472_v49 = vpop.f32.mrb[14].mxu0  ;;  %v745_v50 = vmul.f32 %v665_v48, %v448_v30  ;;  %v1689_v51 = vpop.f32.mrb[15].mxu1 }
 0x10a   : > { %v1691_v52 = vpop.f32.mrb[15].mxu0 }
 0x10b   : > { %1178 = vmatmul.mubr.f32.gmra.mrb[26].mxu0 %v745_v50 }
 0x10c   : > { %v671_v53 = vpop.f32.mrb[16].mxu1 }
 0x10d   : > { %v478_v54 = vpop.f32.mrb[16].mxu0  ;;  %v746_v55 = vmul.f32 %v671_v53, %v454_v34  ;;  %v1693_v56 = vpop.f32.mrb[17].mxu1 }
 0x10e   : > { %v1695_v57 = vpop.f32.mrb[17].mxu0 }
 0x10f   : > { %1180 = vmatprep.mubr.f32.mxu0 %v746_v55 }
 0x110   : > { %v677_v58 = vpop.f32.mrb[18].mxu1 }
 0x111   : > { %v484_v59 = vpop.f32.mrb[18].mxu0  ;;  %v747_v60 = vmul.f32 %v677_v58, %v460_v39  ;;  %v1697_v61 = vpop.f32.mrb[19].mxu1 }
 0x112   : > { %v1699_v62 = vpop.f32.mrb[19].mxu0 }
 0x113   : > { %1181 = vmatmul.mubr.f32.gmra.mrb[28].mxu0 %v747_v60 }
 0x114   : > { %v683_v63 = vpop.f32.mrb[20].mxu1 }
 0x115   : > { %v490_v0 = vpop.f32.mrb[20].mxu0  ;;  %v748_v1 = vmul.f32 %v683_v63, %v466_v44  ;;  %v1701_v2 = vpop.f32.mrb[21].mxu1 }
 0x116   : > { %v1703_v3 = vpop.f32.mrb[21].mxu0 }
 0x117   : > { %1183 = vmatprep.mubr.f32.mxu0 %v748_v1 }
 0x118   : > { %v689_v4 = vpop.f32.mrb[22].mxu1 }
 0x119   : > { %v496_v5 = vpop.f32.mrb[22].mxu0  ;;  %v749_v6 = vmul.f32 %v689_v4, %v472_v49  ;;  %v1705_v7 = vpop.f32.mrb[23].mxu1 }
 0x11a   : > { %v1707_v8 = vpop.f32.mrb[23].mxu0 }
 0x11b   : > { %1184 = vmatmul.mubr.f32.gmra.mrb[30].mxu0 %v749_v6 }
 0x11c   : > { %v695_v9 = vpop.f32.mrb[24].mxu1 }
 0x11d   : > { %v750_v10 = vmul.f32 %v695_v9, %v478_v54  ;;  %v1709_v11 = vpop.f32.mrb[25].mxu1 }
 0x11f   : > { %1186 = vmatprep.mubr.f32.mxu0 %v750_v10 }
 0x120   : > { %v701_v12 = vpop.f32.mrb[26].mxu1 }
 0x121   : > { %v751_v13 = vmul.f32 %v701_v12, %v484_v59  ;;  %v1711_v14 = vpop.f32.mrb[27].mxu1 }
 0x123   : > { %1187 = vmatmul.mubr.f32.gmra.mrb[32].mxu0 %v751_v13 }
 0x124   : > { %v707_v15 = vpop.f32.mrb[28].mxu1 }
 0x125   : > { %v752_v16 = vmul.f32 %v707_v15, %v490_v0  ;;  %v1713_v18 = vpop.f32.mrb[29].mxu1 }
 0x127   : > { %1189 = vmatprep.mubr.f32.mxu0 %v752_v16 }
 0x128   : > { %v713_v22 = vpop.f32.mrb[30].mxu1 }
 0x129   : > { %v753_v26 = vmul.f32 %v713_v22, %v496_v5  ;;  %v1715_v30 = vpop.f32.mrb[31].mxu1 }
 0x12b   : > { %1190 = vmatmul.mubr.f32.gmra.mrb[34].mxu0 %v753_v26 }
 0x12c   : > { %v719_v33 = vpop.f32.mrb[32].mxu1 }
 0x12d   : > { %v754_v34 = vmul.f32 %v719_v33, %v1653_v17  ;;  %v1718_v35 = vpop.f32.mrb[33].mxu1 }
 0x12f   : > { %1192 = vmatprep.mubr.f32.mxu0 %v754_v34 }
 0x130   : > { %v725_v38 = vpop.f32.mrb[34].mxu1 }
 0x131   : > { %v755_v39 = vmul.f32 %v725_v38, %v1659_v21  ;;  %v1721_v40 = vpop.f32.mrb[35].mxu1 }
 0x133   : > { %1193 = vmatmul.mubr.f32.gmra.mrb[36].mxu0 %v755_v39 }
 0x134   : > { %v731_v43 = vpop.f32.mrb[36].mxu1 }
 0x135   : > { %v756_v44 = vmul.f32 %v731_v43, %v1665_v25  ;;  %v1724_v45 = vpop.f32.mrb[37].mxu1  ;;  %v1736_v25 = vld [vmem:[%s1860_s5] ss:$0 sm:$0xff] }
 0x137   : > { %1195 = vmatprep.mubr.f32.mxu0 %v756_v44 }
 0x138   : > { %v737_v48 = vpop.f32.mrb[38].mxu1 }
 0x139   : > { %v757_v49 = vmul.f32 %v737_v48, %v1671_v29  ;;  %v1727_v17 = vpop.f32.mrb[39].mxu1 }
 0x13b   : > { %1196 = vmatmul.mubr.f32.gmra.mrb[38].mxu0 %v757_v49 }
 0x1d6   : > { %v1176_v50 = vpop.f32.mrb[24].mxu0 }
 0x1d7   : > { %v846_v21 = vadd.f32 %v1176_v50, %v1663_v24  ;;  %v840_v53 = vpop.f32.mrb[25].mxu0 }
 0x1d8   : > { %v841_v54 = vadd.f32 %v840_v53, %v1657_v20 }
 0x1d9   : > { %v920_v55 = vadd.f32 %v846_v21, %v1681_v41 }
 0x1da   : > { %v919_v29 = vadd.f32 %v841_v54, %v1677_v36 }
 0x1db   : > { %v943_v58 = vadd.f32 %v1736_v25, %v920_v55 }
 0x1dc   : > { %v942_v59 = vadd.f32 %v1736_v25, %v919_v29 }
 0x1dd   : > { %959 = vst [vmem:[%s1743_s14 + $0x8] sm:$0xff] %v943_v58 }
 0x1de   : > { %958 = vst [vmem:[%s1743_s14] sm:$0xff] %v942_v59  ;;  %v1179_v24 = vpop.f32.mrb[26].mxu0 }
 0x1df   : > { %v856_v60 = vadd.f32 %v1179_v24, %v1675_v32  ;;  %v850_v20 = vpop.f32.mrb[27].mxu0 }
 0x1e0   : > { %v851_v41 = vadd.f32 %v850_v20, %v1669_v28 }
 0x1e1   : > { %v922_v36 = vadd.f32 %v856_v60, %v1689_v51 }
 0x1e2   : > { %v921_v63 = vadd.f32 %v851_v41, %v1685_v46 }
 0x1e3   : > { %v945_v0 = vadd.f32 %v1736_v25, %v922_v36 }
 0x1e4   : > { %v944_v1 = vadd.f32 %v1736_v25, %v921_v63 }
 0x1e5   : > { %961 = vst [vmem:[%s1743_s14 + $0x18] sm:$0xff] %v945_v0 }
 0x1e6   : > { %960 = vst [vmem:[%s1743_s14 + $0x10] sm:$0xff] %v944_v1  ;;  %v1182_v4 = vpop.f32.mrb[28].mxu0 }
 0x1e7   : > { %v866_v5 = vadd.f32 %v1182_v4, %v1683_v42  ;;  %v860_v6 = vpop.f32.mrb[29].mxu0 }
 0x1e8   : > { %v861_v32 = vadd.f32 %v860_v6, %v1679_v37 }
 0x1e9   : > { %v924_v28 = vadd.f32 %v866_v5, %v1697_v61 }
 0x1ea   : > { %v923_v51 = vadd.f32 %v861_v32, %v1693_v56 }
 0x1eb   : > { %v947_v46 = vadd.f32 %v1736_v25, %v924_v28 }
 0x1ec   : > { %v946_v9 = vadd.f32 %v1736_v25, %v923_v51 }
 0x1ed   : > { %963 = vst [vmem:[%s1743_s14 + $0x28] sm:$0xff] %v947_v46 }
 0x1ee   : > { %962 = vst [vmem:[%s1743_s14 + $0x20] sm:$0xff] %v946_v9  ;;  %v1185_v10 = vpop.f32.mrb[30].mxu0 }
 0x1ef   : > { %v876_v12 = vadd.f32 %v1185_v10, %v1691_v52  ;;  %v870_v13 = vpop.f32.mrb[31].mxu0 }
 0x1f0   : > { %v871_v42 = vadd.f32 %v870_v13, %v1687_v47 }
 0x1f1   : > { %v926_v37 = vadd.f32 %v876_v12, %v1705_v7 }
 0x1f2   : > { %v925_v61 = vadd.f32 %v871_v42, %v1701_v2 }
 0x1f3   : > { %v949_v56 = vadd.f32 %v1736_v25, %v926_v37 }
 0x1f4   : > { %v948_v15 = vadd.f32 %v1736_v25, %v925_v61 }
 0x1f5   : > { %965 = vst [vmem:[%s1743_s14 + $0x38] sm:$0xff] %v949_v56 }
 0x1f6   : > { %964 = vst [vmem:[%s1743_s14 + $0x30] sm:$0xff] %v948_v15  ;;  %v1188_v16 = vpop.f32.mrb[32].mxu0 }
 0x1f7   : > { %v886_v22 = vadd.f32 %v1188_v16, %v1699_v62  ;;  %v880_v26 = vpop.f32.mrb[33].mxu0 }
 0x1f8   : > { %v881_v52 = vadd.f32 %v880_v26, %v1695_v57 }
 0x1f9   : > { %v928_v47 = vadd.f32 %v886_v22, %v1711_v14 }
 0x1fa   : > { %v927_v7 = vadd.f32 %v881_v52, %v1709_v11 }
 0x1fb   : > { %v951_v2 = vadd.f32 %v1736_v25, %v928_v47 }
 0x1fc   : > { %v950_v33 = vadd.f32 %v1736_v25, %v927_v7 }
 0x1fd   : > { %967 = vst [vmem:[%s1743_s14 + $0x48] sm:$0xff] %v951_v2 }
 0x1fe   : > { %966 = vst [vmem:[%s1743_s14 + $0x40] sm:$0xff] %v950_v33  ;;  %v1191_v34 = vpop.f32.mrb[34].mxu0 }
 0x1ff   : > { %v896_v38 = vadd.f32 %v1191_v34, %v1707_v8  ;;  %v890_v39 = vpop.f32.mrb[35].mxu0 }
 0x200   : > { %v891_v62 = vadd.f32 %v890_v39, %v1703_v3 }
 0x201   : > { %v930_v57 = vadd.f32 %v896_v38, %v1715_v30 }
 0x202   : > { %v929_v14 = vadd.f32 %v891_v62, %v1713_v18 }
 0x203   : > { %v953_v11 = vadd.f32 %v1736_v25, %v930_v57 }
 0x204   : > { %v952_v43 = vadd.f32 %v1736_v25, %v929_v14 }
 0x205   : > { %969 = vst [vmem:[%s1743_s14 + $0x58] sm:$0xff] %v953_v11 }
 0x206   : > { %968 = vst [vmem:[%s1743_s14 + $0x50] sm:$0xff] %v952_v43  ;;  %v1194_v44 = vpop.f32.mrb[36].mxu0 }
 0x207   : > { %v906_v8 = vadd.f32 %v1194_v44, %v1661_v23  ;;  %v900_v48 = vpop.f32.mrb[37].mxu0 }
 0x208   : > { %v901_v49 = vadd.f32 %v900_v48, %v1655_v19 }
 0x209   : > { %v932_v3 = vadd.f32 %v906_v8, %v1721_v40 }
 0x20a   : > { %v931_v30 = vadd.f32 %v901_v49, %v1718_v35 }
 0x20b   : > { %v955_v18 = vadd.f32 %v1736_v25, %v932_v3 }
 0x20c   : > { %v954_v50 = vadd.f32 %v1736_v25, %v931_v30 }
 0x20d   : > { %971 = vst [vmem:[%s1743_s14 + $0x68] sm:$0xff] %v955_v18 }
 0x20e   : > { %970 = vst [vmem:[%s1743_s14 + $0x60] sm:$0xff] %v954_v50  ;;  %v1197_v21 = vpop.f32.mrb[38].mxu0 }
 0x20f   : > { %v916_v53 = vadd.f32 %v1197_v21, %v1673_v31  ;;  %v910_v23 = vpop.f32.mrb[39].mxu0 }
 0x210   : > { %v911_v19 = vadd.f32 %v910_v23, %v1667_v27 }
 0x211   : > { %v934_v35 = vadd.f32 %v916_v53, %v1727_v17 }
 0x212   : > { %v933_v40 = vadd.f32 %v911_v19, %v1724_v45 }
 0x213   : > { %v957_v54 = vadd.f32 %v1736_v25, %v934_v35 }
 0x214   : > { %v956_v27 = vadd.f32 %v1736_v25, %v933_v40 }
 0x215   : > { %973 = vst [vmem:[%s1743_s14 + $0x78] sm:$0xff] %v957_v54 }
 0x216   : > { %972 = vst [vmem:[%s1743_s14 + $0x70] sm:$0xff] %v956_v27 }
 0x217   : > { %1305 = shalt.err (!%p1302_p3)
}
 0x218   : > { %s1306_s29 = scalar_lea.hbm %s1805_s26, 2048  ;;  %s1310_s11 = scalar_lea.hbm %s1861_s6, 4096 }
 0x219   : > { %p1307_p4 = scmp.ne.s32.totalorder %s1805_s26, %s1306_s29  ;;  %p1311_p9 = scmp.lt.u32.totalorder %s1805_s26, %s1861_s6 }
 0x21a   : > { %p1312_p10 = scmp.lt.u32.totalorder %s1310_s11, %s1306_s29  ;;  %p1314_p12 = scmp.lt.u32.totalorder %s1306_s29, %s1805_s26 }
 0x21b   : > { %p1308_p7 = pnand %p1307_p4, %p1433_p5 }
 0x21c   : > { %p1313_p11 = por %p1312_p10, %p1311_p9 }
 0x21d   : > { %p1309_p8 = pneg %p1308_p7 }
 0x21e   : > { %p1315_p13 = por %p1314_p12, %p1313_p11 }
 0x220   : > { %p1316_p0 = pnand %p1315_p13, %p1309_p8 }
 0x222   : > { %1319 = shalt.err (!%p1316_p0)
}
 0x223   : > { %s1358_s16 = smov 128   ;;  %s1359_s19 = smov 8  }
 0x224   : > { %1250 = dma.vmem_to_hbm [thread:$0]  (%p1433_p5), %s1807_s17, 2048, %s1805_s26, %s1814_s25, %s1358_s16, %s1358_s16, %s1359_s19  }
 0x225 PF: > { %p1256_p1 = scmp.ge.s32.totalorder %s1354_s24, 2  ;;  %s1003_s20 = sand.u32 1, %s1342_s21  }
 0x226   : > { %s1004_s15 = scalar_lea.sflag [#allocation3], %s1003_s20 }
 0x227   : > { %p1253_p2 = pnand %p1256_p1, %p1437_p6 }
 0x229   : > { %1337 = dma.done.wait (!%p1253_p2), %s1004_s15, 2048  }
 0x22a   : > { %1339 = vsyncadd (!%p1253_p2), %s1004_s15, 4294965248  ;;  %p16_p3 = scmp.ge.s32.totalorder %s1420_s27, 4   ;;  %s1864_s21 = smov %s1346_s22 }
 0x22b   : > { %s1865_s22 = smov %s1350_s23  ;;  %s1866_s23 = smov %s1431_s30 }
 0x22c   : > { %s1867_s24 = smov %s1420_s27  ;;  %18 = sbr.rel (!%p16_p3) target bundleno = 3 (0x3), region = 82 }
 0x233   :  { %1009 = vsyncpa [#allocation3], 1 }
 0x234   :  { %1011 = vsyncpa [#allocation3 + $0x1], 1 }

// kernel: tpu_custom_call.1
= control target key start
LH: loop header
LB: loop body
LE: loop exit
PB: predicated region body
PF: predicated region fallthrough
CT: control target
= control target key end

     0   :  { %11 = vsyncpa [#allocation3], 0  ;;  %s1855_s0 = inlined_call_operand.vmem [shape: f32[256,32], index: 0, kind: input, shape index: {}]   ;;  %s1856_s1 = inlined_call_operand.vmem [shape: f32[256,32], index: 1, kind: input, shape index: {}]   ;;  %s1857_s2 = inlined_call_operand.vmem [shape: f32[32,256], index: 2, kind: input, shape index: {}]   ;;  %s1858_s3 = inlined_call_operand.vmem [shape: f32[32,256], index: 3, kind: input, shape index: {}]   ;;  %s1859_s4 = inlined_call_operand.vmem [shape: f32[128,128], index: 4, kind: input, shape index: {}]   ;;  %s1860_s5 = inlined_call_operand.vmem [shape: f32[1,128], index: 5, kind: input, shape index: {}]   ;;  %s1861_s6 = inlined_call_operand.hbm [shape: f32[256,128], index: 6, kind: output, shape index: {}]  }
   0x1   :  { %13 = vsyncpa [#allocation3 + $0x1], 0  ;;  %s1395_s21 = smov 0   ;;  %s1397_s22 = smov 0  }
   0x2   :  { %s1399_s23 = smov 0   ;;  %s1401_s24 = smov 0  }
   0x3 LB: > { %s1416_s25 = sadd.s32 4294967295, %s1354_s24   ;;  %s1062_s26 = sadd.s32 4294967294, %s1354_s24   ;;  %s1354_s24 = sphi %s1401_s24, %s1867_s24   ;;  %s1350_s23 = sphi %s1399_s23, %s1866_s23   ;;  %s1346_s22 = sphi %s1397_s22, %s1865_s22   ;;  %s1342_s21 = sphi %s1395_s21, %s1864_s21  }
   0x4   : > { %s1420_s27 = sadd.s32 1, %s1354_s24   ;;  %s162_s28 = sadd.s32 1, %s1350_s23 }
   0x5   : > { %s159_s29 = ssub.s32 %s1354_s24, %s1420_s27  ;;  %p172_p0 = scmp.ne.s32.totalorder %s1350_s23, %s1346_s22 }
   0x6   : > { %p160_p1 = scmp.eq.s32.totalorder %s159_s29, 0  ;;  %p173_p2 = scmp.eq.s32.totalorder %s1416_s25, 1 }
   0x7   : > { %p178_p3 = scmp.ne.s32.totalorder %s1346_s22, %s1342_s21  ;;  %p179_p4 = scmp.eq.s32.totalorder %s1062_s26, 1 }
   0x8   : > { %s1431_s30 = scalar_select %p160_p1, %s1350_s23, %s162_s28  }
   0x9   : > { %p1433_p5 = por %p173_p2, %p172_p0  ;;  %p1437_p6 = por %p179_p4, %p178_p3 }
   0xa   : > { %p1065_p7 = scmp.ge.s32.totalorder %s1354_s24, 1  ;;  %p227_p8 = scmp.lt.s32.totalorder %s1354_s24, 3 }
   0xc   : > { %p228_p9 = pnand %p1065_p7, %p227_p8 }
   0xd   : > { %v308_v0 = vld [vmem:[%s1857_s2 + $0x8] sm:$0xff] (!%p228_p9)  ;;  %v310_v1 = vld [vmem:[%s1857_s2 + $0x18] sm:$0xff] (!%p228_p9)  ;;  %v307_v2 = vld [vmem:[%s1857_s2] sm:$0xff] (!%p228_p9)  ;;  %s1067_s15 = sshll.u32 (!%p228_p9), %s1416_s25, 4  ;;  %v1356_v7 = vmov (!%p228_p9), 0.0   ;;  %vm315_vm0 = vcmask (!%p228_p9), 261120  }
   0xe   : > { %231 = sbr.rel (%p228_p9) target bundleno = 549 (0x225), region = 44  ;;  %v1198_v3 = vpack.c.bf16 (!%p228_p9), %v310_v1, %v308_v0  ;;  %v309_v4 = vld [vmem:[%s1857_s2 + $0x10] sm:$0xff] (!%p228_p9)  ;;  %v312_v5 = vld [vmem:[%s1857_s2 + $0x28] sm:$0xff] (!%p228_p9)  ;;  %v314_v6 = vld [vmem:[%s1857_s2 + $0x38] sm:$0xff] (!%p228_p9)  ;;  %500 = vmatprep.mubr.f32.mxu1 (!%p228_p9), %v1356_v7  ;;  %p263_p10 = scmp.lt.s32.totalorder (!%p228_p9), %s1067_s15, 31  ;;  %428 = vmatprep.mubr.f32.mxu0 (!%p228_p9), %v1356_v7 }
   0xf   : > { %v1200_v8 = vpack.c.bf16 (!%p228_p9), %v309_v4, %v307_v2  ;;  %v1202_v9 = vpack.c.bf16 (!%p228_p9), %v314_v6, %v312_v5  ;;  %v311_v10 = vld [vmem:[%s1857_s2 + $0x20] sm:$0xff] (!%p228_p9)  ;;  %v313_v11 = vld [vmem:[%s1857_s2 + $0x30] sm:$0xff] (!%p228_p9)  ;;  %v526_v12 = vld [vmem:[%s1858_s3 + $0x8] sm:$0xff] (!%p228_p9)  ;;  %s259_s9 = sand.u32 (!%p228_p9), 1, %s1346_s22   ;;  %s1109_s16 = sshll.u32 (!%p228_p9), %s1416_s25, 11 }
  0x10   : > { %1246 = vmatprep.subr.bf16.mxu1 (!%p228_p9), %v1198_v3  ;;  %v528_v13 = vld [vmem:[%s1858_s3 + $0x18] sm:$0xff] (!%p228_p9)  ;;  %1199 = vmatprep.subr.bf16.mxu0 (!%p228_p9), %v1198_v3  ;;  %v1204_v14 = vpack.c.bf16 (!%p228_p9), %v313_v11, %v311_v10  ;;  %v525_v15 = vld [vmem:[%s1858_s3] sm:$0xff] (!%p228_p9)  ;;  %v527_v17 = vld [vmem:[%s1858_s3 + $0x10] sm:$0xff] (!%p228_p9)  ;;  %s1066_s10 = sshll.u32 (!%p228_p9), %s259_s9, 7  ;;  %s1814_s25 = scalar_lea.sflag (!%p228_p9), [#allocation3], %s259_s9 }
  0x11   : > { %1248 = vmatpush1.bf16.msra.mxu1 (!%p228_p9), %v1200_v8  ;;  %1201 = vmatpush1.bf16.msra.mxu0 (!%p228_p9), %v1200_v8  ;;  %v1206_v16 = vpack.c.bf16 (!%p228_p9), %v528_v13, %v526_v12  ;;  %v758_v18 = vld [vmem:[%s1859_s4] sm:$0xff] (!%p228_p9)  ;;  %v759_v19 = vld [vmem:[%s1859_s4 + $0x8] sm:$0xff] (!%p228_p9)  ;;  %v532_v21 = vld [vmem:[%s1858_s3 + $0x38] sm:$0xff] (!%p228_p9)  ;;  %v1208_v24 = vpack.c.bf16 (!%p228_p9), %v527_v17, %v525_v15  ;;  %s1743_s14 = scalar_lea.vmem (!%p228_p9), [#allocation2], %s1066_s10 }
  0x12   : > { %1247 = vmatprep.subr.bf16.mxu1 (!%p228_p9), %v1202_v9  ;;  %1203 = vmatprep.subr.bf16.mxu0 (!%p228_p9), %v1202_v9  ;;  %v530_v20 = vld [vmem:[%s1858_s3 + $0x28] sm:$0xff] (!%p228_p9)  ;;  %v1214_v22 = vpack.c.bf16 (!%p228_p9), %v759_v19, %v758_v18  ;;  %v529_v27 = vld [vmem:[%s1858_s3 + $0x20] sm:$0xff] (!%p228_p9)  ;;  %v531_v28 = vld [vmem:[%s1858_s3 + $0x30] sm:$0xff] (!%p228_p9)  ;;  %s988_s17 = sshll.u32 (!%p228_p9), %s1743_s14, 4  ;;  %s1807_s17 = int_to_ptr.vmem [resolvable:$true] %s988_s17 }
  0x13   : > { %v1210_v26 = vpack.c.bf16 (!%p228_p9), %v532_v21, %v530_v20  ;;  %v760_v29 = vld [vmem:[%s1859_s4 + $0x10] sm:$0xff] (!%p228_p9)  ;;  %v761_v30 = vld [vmem:[%s1859_s4 + $0x18] sm:$0xff] (!%p228_p9)  ;;  %v1212_v32 = vpack.c.bf16 (!%p228_p9), %v531_v28, %v529_v27  ;;  %v762_v35 = vld [vmem:[%s1859_s4 + $0x20] sm:$0xff] (!%p228_p9) }
  0x14   : > { %v1218_v34 = vpack.c.bf16 (!%p228_p9), %v761_v30, %v760_v29  ;;  %v763_v38 = vld [vmem:[%s1859_s4 + $0x28] sm:$0xff] (!%p228_p9)  ;;  %v764_v2 = vld [vmem:[%s1859_s4 + $0x30] sm:$0xff] (!%p228_p9)  ;;  %v765_v3 = vld [vmem:[%s1859_s4 + $0x38] sm:$0xff] (!%p228_p9) }
  0x15   : > { %s1869_s15 = smov (!%p263_p10, %s1067_s15), 31  ;;  %1249 = vmatpush1.bf16.msra.mxu1 %v1204_v14  ;;  %1205 = vmatpush1.bf16.msra.mxu0 %v1204_v14  ;;  %v1222_v39 = vpack.c.bf16 %v763_v38, %v762_v35  ;;  %v1226_v4 = vpack.c.bf16 %v765_v3, %v764_v2  ;;  %v766_v5 = vld [vmem:[%s1859_s4 + $0x40] sm:$0xff]  ;;  %v767_v6 = vld [vmem:[%s1859_s4 + $0x48] sm:$0xff]  ;;  %v768_v8 = vld [vmem:[%s1859_s4 + $0x50] sm:$0xff] }
  0x16   : > { %s1068_s18 = sshll.u32 %s1869_s15, 3  ;;  %1207 = vmatprep.subr.bf16.mxu1 %v1206_v16  ;;  %1215 = vmatprep.subr.bf16.mxu0 %v1214_v22  ;;  %v769_v9 = vld [vmem:[%s1859_s4 + $0x58] sm:$0xff]  ;;  %v770_v11 = vld [vmem:[%s1859_s4 + $0x60] sm:$0xff]  ;;  %v771_v12 = vld [vmem:[%s1859_s4 + $0x68] sm:$0xff]  ;;  %s1292_s15 = scalar_lea.vmem %s1807_s17, 2048 }
  0x17   : > { %s1496_s12 = scalar_lea.vmem %s1855_s0, %s1068_s18  ;;  %s1547_s26 = scalar_lea.vmem %s1856_s1, %s1068_s18  ;;  %v1234_v10 = vpack.c.bf16 %v769_v9, %v768_v8  ;;  %v1238_v13 = vpack.c.bf16 %v771_v12, %v770_v11  ;;  %v772_v14 = vld [vmem:[%s1859_s4 + $0x70] sm:$0xff]  ;;  %v773_v15 = vld [vmem:[%s1859_s4 + $0x78] sm:$0xff] }
  0x18   : > { %v287_v23 = vld [vmem:[%s1496_s12 + $0x60] sm:$0xff]  ;;  %v288_v31 = vld [vmem:[%s1496_s12 + $0x68] sm:$0xff]  ;;  %v289_v36 = vld [vmem:[%s1496_s12 + $0x70] sm:$0xff]  ;;  %v1242_v16 = vpack.c.bf16 %v773_v15, %v772_v14  ;;  %p1293_p11 = scmp.ne.s32.totalorder %s1807_s17, %s1292_s15  ;;  %s1357_s18 = smov [#allocation2]  }
  0x19   : > { %v275_v25 = vld [vmem:[%s1496_s12] sm:$0xff]  ;;  %1083 = vmatmul.mubr.msk.f32.vlgmr.msra.gmra.mrb[0].mxu1 %vm315_vm0, %v287_v23  ;;  %v276_v33 = vld [vmem:[%s1496_s12 + $0x8] sm:$0xff]  ;;  %v277_v37 = vld [vmem:[%s1496_s12 + $0x10] sm:$0xff] }
  0x1a   : > { %1071 = vmatmul.mubr.msk.f32.vlgmr.msra.gmra.mrb[0].mxu0 %vm315_vm0, %v275_v25  ;;  %1209 = vmatpush1.bf16.msra.mxu1 %v1208_v24  ;;  %v290_v40 = vld [vmem:[%s1496_s12 + $0x78] sm:$0xff]  ;;  %v291_v42 = vld [vmem:[%s1547_s26] sm:$0xff]  ;;  %v292_v44 = vld [vmem:[%s1547_s26 + $0x8] sm:$0xff]  ;;  %p1294_p12 = pnand %p1293_p11, %p1433_p5 }
  0x1b   : > { %506 = vmatprep.mubr.f32.mxu1 %v1356_v7  ;;  %1211 = vmatprep.subr.bf16.mxu1 %v1210_v26  ;;  %v278_v41 = vld [vmem:[%s1496_s12 + $0x18] sm:$0xff]  ;;  %v279_v43 = vld [vmem:[%s1496_s12 + $0x20] sm:$0xff]  ;;  %v280_v45 = vld [vmem:[%s1496_s12 + $0x28] sm:$0xff] }
  0x1c   : > { %434 = vmatprep.mubr.f32.mxu0 %v1356_v7  ;;  %1217 = vmatpush3.bf16.msra.mxu0 %v1214_v22  ;;  %v293_v46 = vld [vmem:[%s1547_s26 + $0x10] sm:$0xff]  ;;  %v294_v48 = vld [vmem:[%s1547_s26 + $0x18] sm:$0xff]  ;;  %v295_v50 = vld [vmem:[%s1547_s26 + $0x20] sm:$0xff]  ;;  %p1295_p13 = pneg %p1294_p12 }
  0x1d   : > { %1084 = vmatmul.mubr.msk.f32.gmra.mrb[2].mxu1 %vm315_vm0, %v288_v31  ;;  %1219 = vmatprep.subr.bf16.mxu0 %v1218_v34  ;;  %v281_v47 = vld [vmem:[%s1496_s12 + $0x30] sm:$0xff]  ;;  %v282_v49 = vld [vmem:[%s1496_s12 + $0x38] sm:$0xff]  ;;  %v283_v51 = vld [vmem:[%s1496_s12 + $0x40] sm:$0xff] }
  0x1e   : > { %1072 = vmatmul.mubr.msk.f32.gmra.mrb[2].mxu0 %vm315_vm0, %v276_v33  ;;  %512 = vmatprep.mubr.f32.mxu1 %v1356_v7  ;;  %v296_v52 = vld [vmem:[%s1547_s26 + $0x28] sm:$0xff]  ;;  %v297_v54 = vld [vmem:[%s1547_s26 + $0x30] sm:$0xff]  ;;  %v298_v56 = vld [vmem:[%s1547_s26 + $0x38] sm:$0xff] }
  0x1f   : > { %1213 = vmatpush1.bf16.msra.mxu1 %v1212_v32  ;;  %440 = vmatprep.mubr.f32.mxu0 %v1356_v7  ;;  %v284_v53 = vld [vmem:[%s1496_s12 + $0x48] sm:$0xff]  ;;  %v285_v55 = vld [vmem:[%s1496_s12 + $0x50] sm:$0xff]  ;;  %v286_v57 = vld [vmem:[%s1496_s12 + $0x58] sm:$0xff]  ;;  %s1296_s12 = sshll.u32 %s1357_s18, 4  ;;  %s1297_s12 = int_to_ptr.vmem [resolvable:$false] %s1296_s12 }
  0x20   : > { %1221 = vmatpush3.bf16.msra.mxu0 %v1218_v34  ;;  %v299_v58 = vld [vmem:[%s1547_s26 + $0x40] sm:$0xff]  ;;  %v300_v59 = vld [vmem:[%s1547_s26 + $0x48] sm:$0xff]  ;;  %v301_v60 = vld [vmem:[%s1547_s26 + $0x50] sm:$0xff]  ;;  %s1298_s28 = scalar_lea.vmem %s1297_s12, 4096  ;;  %p1299_p0 = scmp.lt.s32.totalorder %s1807_s17, %s1297_s12 }
  0x21   : > { %1085 = vmatmul.mubr.msk.f32.gmra.mrb[4].mxu1 %vm315_vm0, %v289_v36  ;;  %1223 = vmatprep.subr.bf16.mxu0 %v1222_v39  ;;  %v302_v61 = vld [vmem:[%s1547_s26 + $0x58] sm:$0xff]  ;;  %v303_v62 = vld [vmem:[%s1547_s26 + $0x60] sm:$0xff]  ;;  %v304_v63 = vld [vmem:[%s1547_s26 + $0x68] sm:$0xff]  ;;  %p1300_p1 = scmp.lt.s32.totalorder %s1298_s28, %s1292_s15 }
  0x22   : > { %1073 = vmatmul.mubr.msk.f32.gmra.mrb[4].mxu0 %vm315_vm0, %v277_v37  ;;  %518 = vmatprep.mubr.f32.mxu1 %v1356_v7  ;;  %v305_v0 = vld [vmem:[%s1547_s26 + $0x70] sm:$0xff]  ;;  %v306_v1 = vld [vmem:[%s1547_s26 + $0x78] sm:$0xff]  ;;  %s1805_s26 = scalar_lea.hbm %s1861_s6, %s1109_s16 }
  0x23   : > { %446 = vmatprep.mubr.f32.mxu0 %v1356_v7  ;;  %p1301_p2 = por %p1300_p1, %p1299_p0 }
  0x24   : > { %1225 = vmatpush3.bf16.msra.mxu0 %v1222_v39 }
  0x25   : > { %1086 = vmatmul.mubr.msk.f32.gmra.mrb[6].mxu1 %vm315_vm0, %v290_v40  ;;  %1227 = vmatprep.subr.bf16.mxu0 %v1226_v4  ;;  %p1302_p3 = pnand %p1301_p2, %p1295_p13 }
  0x26   : > { %1074 = vmatmul.mubr.msk.f32.gmra.mrb[6].mxu0 %vm315_vm0, %v278_v41  ;;  %645 = vmatprep.mubr.f32.mxu1 %v1356_v7 }
  0x27   : > { %452 = vmatprep.mubr.f32.mxu0 %v1356_v7 }
  0x28   : > { %1229 = vmatpush3.bf16.msra.mxu0 %v1226_v4 }
  0x29   : > { %1087 = vmatmul.mubr.msk.f32.vlgmr.msra.gmra.mrb[8].mxu1 %vm315_vm0, %v291_v42 }
  0x2a   : > { %1075 = vmatmul.mubr.msk.f32.gmra.mrb[8].mxu0 %vm315_vm0, %v279_v43  ;;  %651 = vmatprep.mubr.f32.mxu1 %v1356_v7 }
  0x2b   : > { %458 = vmatprep.mubr.f32.mxu0 %v1356_v7 }
  0x2d   : > { %1088 = vmatmul.mubr.msk.f32.gmra.mrb[10].mxu1 %vm315_vm0, %v292_v44 }
  0x2e   : > { %1076 = vmatmul.mubr.msk.f32.gmra.mrb[10].mxu0 %vm315_vm0, %v280_v45  ;;  %657 = vmatprep.mubr.f32.mxu1 %v1356_v7 }
  0x2f   : > { %464 = vmatprep.mubr.f32.mxu0 %v1356_v7 }
  0x31   : > { %1089 = vmatmul.mubr.msk.f32.gmra.mrb[12].mxu1 %vm315_vm0, %v293_v46 }
  0x32   : > { %1077 = vmatmul.mubr.msk.f32.gmra.mrb[12].mxu0 %vm315_vm0, %v281_v47  ;;  %663 = vmatprep.mubr.f32.mxu1 %v1356_v7 }
  0x33   : > { %470 = vmatprep.mubr.f32.mxu0 %v1356_v7 }
  0x35   : > { %1090 = vmatmul.mubr.msk.f32.gmra.mrb[14].mxu1 %vm315_vm0, %v294_v48 }
  0x36   : > { %1078 = vmatmul.mubr.msk.f32.gmra.mrb[14].mxu0 %vm315_vm0, %v282_v49  ;;  %669 = vmatprep.mubr.f32.mxu1 %v1356_v7 }
  0x37   : > { %476 = vmatprep.mubr.f32.mxu0 %v1356_v7 }
  0x39   : > { %1091 = vmatmul.mubr.msk.f32.gmra.mrb[16].mxu1 %vm315_vm0, %v295_v50 }
  0x3a   : > { %1079 = vmatmul.mubr.msk.f32.gmra.mrb[16].mxu0 %vm315_vm0, %v283_v51  ;;  %675 = vmatprep.mubr.f32.mxu1 %v1356_v7 }
  0x3b   : > { %482 = vmatprep.mubr.f32.mxu0 %v1356_v7 }
  0x3d   : > { %1092 = vmatmul.mubr.msk.f32.gmra.mrb[18].mxu1 %vm315_vm0, %v296_v52 }
  0x3e   : > { %1080 = vmatmul.mubr.msk.f32.gmra.mrb[18].mxu0 %vm315_vm0, %v284_v53  ;;  %681 = vmatprep.mubr.f32.mxu1 %v1356_v7 }
  0x3f   : > { %488 = vmatprep.mubr.f32.mxu0 %v1356_v7 }
  0x41   : > { %1093 = vmatmul.mubr.msk.f32.gmra.mrb[20].mxu1 %vm315_vm0, %v297_v54 }
  0x42   : > { %1081 = vmatmul.mubr.msk.f32.gmra.mrb[20].mxu0 %vm315_vm0, %v285_v55  ;;  %687 = vmatprep.mubr.f32.mxu1 %v1356_v7 }
  0x43   : > { %494 = vmatprep.mubr.f32.mxu0 %v1356_v7 }
  0x45   : > { %1094 = vmatmul.mubr.msk.f32.gmra.mrb[22].mxu1 %vm315_vm0, %v298_v56 }
  0x46   : > { %1082 = vmatmul.mubr.msk.f32.gmra.mrb[22].mxu0 %vm315_vm0, %v286_v57  ;;  %693 = vmatprep.mubr.f32.mxu1 %v1356_v7 }
  0x49   : > { %1095 = vmatmul.mubr.msk.f32.gmra.mrb[24].mxu1 %vm315_vm0, %v299_v58 }
  0x4a   : > { %699 = vmatprep.mubr.f32.mxu1 %v1356_v7 }
  0x4d   : > { %1096 = vmatmul.mubr.msk.f32.gmra.mrb[26].mxu1 %vm315_vm0, %v300_v59 }
  0x4e   : > { %705 = vmatprep.mubr.f32.mxu1 %v1356_v7 }
  0x51   : > { %1097 = vmatmul.mubr.msk.f32.gmra.mrb[28].mxu1 %vm315_vm0, %v301_v60 }
  0x52   : > { %711 = vmatprep.mubr.f32.mxu1 %v1356_v7 }
  0x55   : > { %1098 = vmatmul.mubr.msk.f32.gmra.mrb[30].mxu1 %vm315_vm0, %v302_v61 }
  0x56   : > { %717 = vmatprep.mubr.f32.mxu1 %v1356_v7 }
  0x59   : > { %1099 = vmatmul.mubr.msk.f32.gmra.mrb[32].mxu1 %vm315_vm0, %v303_v62 }
  0x5a   : > { %723 = vmatprep.mubr.f32.mxu1 %v1356_v7 }
  0x5d   : > { %1100 = vmatmul.mubr.msk.f32.gmra.mrb[34].mxu1 %vm315_vm0, %v304_v63 }
  0x5e   : > { %729 = vmatprep.mubr.f32.mxu1 %v1356_v7 }
  0x61   : > { %1101 = vmatmul.mubr.msk.f32.gmra.mrb[36].mxu1 %vm315_vm0, %v305_v0 }
  0x62   : > { %735 = vmatprep.mubr.f32.mxu1 %v1356_v7  ;;  %v1230_v7 = vpack.c.bf16 %v767_v6, %v766_v5 }
  0x64   : > { %1231 = vmatprep.subr.bf16.mxu0 %v1230_v7 }
  0x65   : > { %1102 = vmatmul.mubr.msk.f32.gmra.mrb[38].mxu1 %vm315_vm0, %v306_v1  ;;  %1233 = vmatpush3.bf16.msra.mxu0 %v1230_v7 }
  0x66   : > { %1235 = vmatprep.subr.bf16.mxu0 %v1234_v10 }
  0x69   : > { %1237 = vmatpush3.bf16.msra.mxu0 %v1234_v10 }
  0x6a   : > { %1239 = vmatprep.subr.bf16.mxu0 %v1238_v13 }
  0x6d   : > { %1241 = vmatpush3.bf16.msra.mxu0 %v1238_v13 }
  0x6e   : > { %1243 = vmatprep.subr.bf16.mxu0 %v1242_v16 }
  0x71   : > { %1245 = vmatpush3.bf16.msra.mxu0 %v1242_v16 }
  0xec   : > { %v1653_v17 = vpop.f32.mrb[0].mxu1 }
  0xed   : > { %v430_v18 = vpop.f32.mrb[0].mxu0  ;;  %v1655_v19 = vpop.f32.mrb[1].mxu1 }
  0xee   : > { %v1657_v20 = vpop.f32.mrb[1].mxu0 }
  0xf0   : > { %v1659_v21 = vpop.f32.mrb[2].mxu1 }
  0xf1   : > { %v436_v22 = vpop.f32.mrb[2].mxu0  ;;  %v1661_v23 = vpop.f32.mrb[3].mxu1 }
  0xf2   : > { %v1663_v24 = vpop.f32.mrb[3].mxu0 }
  0xf4   : > { %v1665_v25 = vpop.f32.mrb[4].mxu1 }
  0xf5   : > { %v442_v26 = vpop.f32.mrb[4].mxu0  ;;  %v1667_v27 = vpop.f32.mrb[5].mxu1 }
  0xf6   : > { %v1669_v28 = vpop.f32.mrb[5].mxu0 }
  0xf8   : > { %v1671_v29 = vpop.f32.mrb[6].mxu1 }
  0xf9   : > { %v448_v30 = vpop.f32.mrb[6].mxu0  ;;  %v1673_v31 = vpop.f32.mrb[7].mxu1 }
  0xfa   : > { %v1675_v32 = vpop.f32.mrb[7].mxu0 }
  0xfc   : > { %v647_v33 = vpop.f32.mrb[8].mxu1 }
  0xfd   : > { %v454_v34 = vpop.f32.mrb[8].mxu0  ;;  %v742_v35 = vmul.f32 %v647_v33, %v430_v18  ;;  %v1677_v36 = vpop.f32.mrb[9].mxu1 }
  0xfe   : > { %v1679_v37 = vpop.f32.mrb[9].mxu0 }
  0xff   : > { %1174 = vmatprep.mubr.f32.mxu0 %v742_v35 }
 0x100   : > { %v653_v38 = vpop.f32.mrb[10].mxu1 }
 0x101   : > { %v460_v39 = vpop.f32.mrb[10].mxu0  ;;  %v743_v40 = vmul.f32 %v653_v38, %v436_v22  ;;  %v1681_v41 = vpop.f32.mrb[11].mxu1 }
 0x102   : > { %v1683_v42 = vpop.f32.mrb[11].mxu0 }
 0x103   : > { %1175 = vmatmul.mubr.f32.vlgmr.msra.gmra.mrb[24].mxu0 %v743_v40 }
 0x104   : > { %v659_v43 = vpop.f32.mrb[12].mxu1 }
 0x105   : > { %v466_v44 = vpop.f32.mrb[12].mxu0  ;;  %v744_v45 = vmul.f32 %v659_v43, %v442_v26  ;;  %v1685_v46 = vpop.f32.mrb[13].mxu1 }
 0x106   : > { %v1687_v47 = vpop.f32.mrb[13].mxu0 }
 0x107   : > { %1177 = vmatprep.mubr.f32.mxu0 %v744_v45 }
 0x108   : > { %v665_v48 = vpop.f32.mrb[14].mxu1 }
 0x109   : > { %v472_v49 = vpop.f32.mrb[14].mxu0  ;;  %v745_v50 = vmul.f32 %v665_v48, %v448_v30  ;;  %v1689_v51 = vpop.f32.mrb[15].mxu1 }
 0x10a   : > { %v1691_v52 = vpop.f32.mrb[15].mxu0 }
 0x10b   : > { %1178 = vmatmul.mubr.f32.gmra.mrb[26].mxu0 %v745_v50 }
 0x10c   : > { %v671_v53 = vpop.f32.mrb[16].mxu1 }
 0x10d   : > { %v478_v54 = vpop.f32.mrb[16].mxu0  ;;  %v746_v55 = vmul.f32 %v671_v53, %v454_v34  ;;  %v1693_v56 = vpop.f32.mrb[17].mxu1 }
 0x10e   : > { %v1695_v57 = vpop.f32.mrb[17].mxu0 }
 0x10f   : > { %1180 = vmatprep.mubr.f32.mxu0 %v746_v55 }
 0x110   : > { %v677_v58 = vpop.f32.mrb[18].mxu1 }
 0x111   : > { %v484_v59 = vpop.f32.mrb[18].mxu0  ;;  %v747_v60 = vmul.f32 %v677_v58, %v460_v39  ;;  %v1697_v61 = vpop.f32.mrb[19].mxu1 }
 0x112   : > { %v1699_v62 = vpop.f32.mrb[19].mxu0 }
 0x113   : > { %1181 = vmatmul.mubr.f32.gmra.mrb[28].mxu0 %v747_v60 }
 0x114   : > { %v683_v63 = vpop.f32.mrb[20].mxu1 }
 0x115   : > { %v490_v0 = vpop.f32.mrb[20].mxu0  ;;  %v748_v1 = vmul.f32 %v683_v63, %v466_v44  ;;  %v1701_v2 = vpop.f32.mrb[21].mxu1 }
 0x116   : > { %v1703_v3 = vpop.f32.mrb[21].mxu0 }
 0x117   : > { %1183 = vmatprep.mubr.f32.mxu0 %v748_v1 }
 0x118   : > { %v689_v4 = vpop.f32.mrb[22].mxu1 }
 0x119   : > { %v496_v5 = vpop.f32.mrb[22].mxu0  ;;  %v749_v6 = vmul.f32 %v689_v4, %v472_v49  ;;  %v1705_v7 = vpop.f32.mrb[23].mxu1 }
 0x11a   : > { %v1707_v8 = vpop.f32.mrb[23].mxu0 }
 0x11b   : > { %1184 = vmatmul.mubr.f32.gmra.mrb[30].mxu0 %v749_v6 }
 0x11c   : > { %v695_v9 = vpop.f32.mrb[24].mxu1 }
 0x11d   : > { %v750_v10 = vmul.f32 %v695_v9, %v478_v54  ;;  %v1709_v11 = vpop.f32.mrb[25].mxu1 }
 0x11f   : > { %1186 = vmatprep.mubr.f32.mxu0 %v750_v10 }
 0x120   : > { %v701_v12 = vpop.f32.mrb[26].mxu1 }
 0x121   : > { %v751_v13 = vmul.f32 %v701_v12, %v484_v59  ;;  %v1711_v14 = vpop.f32.mrb[27].mxu1 }
 0x123   : > { %1187 = vmatmul.mubr.f32.gmra.mrb[32].mxu0 %v751_v13 }
 0x124   : > { %v707_v15 = vpop.f32.mrb[28].mxu1 }
 0x125   : > { %v752_v16 = vmul.f32 %v707_v15, %v490_v0  ;;  %v1713_v18 = vpop.f32.mrb[29].mxu1 }
 0x127   : > { %1189 = vmatprep.mubr.f32.mxu0 %v752_v16 }
 0x128   : > { %v713_v22 = vpop.f32.mrb[30].mxu1 }
 0x129   : > { %v753_v26 = vmul.f32 %v713_v22, %v496_v5  ;;  %v1715_v30 = vpop.f32.mrb[31].mxu1 }
 0x12b   : > { %1190 = vmatmul.mubr.f32.gmra.mrb[34].mxu0 %v753_v26 }
 0x12c   : > { %v719_v33 = vpop.f32.mrb[32].mxu1 }
 0x12d   : > { %v754_v34 = vmul.f32 %v719_v33, %v1653_v17  ;;  %v1718_v35 = vpop.f32.mrb[33].mxu1 }
 0x12f   : > { %1192 = vmatprep.mubr.f32.mxu0 %v754_v34 }
 0x130   : > { %v725_v38 = vpop.f32.mrb[34].mxu1 }
 0x131   : > { %v755_v39 = vmul.f32 %v725_v38, %v1659_v21  ;;  %v1721_v40 = vpop.f32.mrb[35].mxu1 }
 0x133   : > { %1193 = vmatmul.mubr.f32.gmra.mrb[36].mxu0 %v755_v39 }
 0x134   : > { %v731_v43 = vpop.f32.mrb[36].mxu1 }
 0x135   : > { %v756_v44 = vmul.f32 %v731_v43, %v1665_v25  ;;  %v1724_v45 = vpop.f32.mrb[37].mxu1  ;;  %v1736_v25 = vld [vmem:[%s1860_s5] ss:$0 sm:$0xff] }
 0x137   : > { %1195 = vmatprep.mubr.f32.mxu0 %v756_v44 }
 0x138   : > { %v737_v48 = vpop.f32.mrb[38].mxu1 }
 0x139   : > { %v757_v49 = vmul.f32 %v737_v48, %v1671_v29  ;;  %v1727_v17 = vpop.f32.mrb[39].mxu1 }
 0x13b   : > { %1196 = vmatmul.mubr.f32.gmra.mrb[38].mxu0 %v757_v49 }
 0x1d6   : > { %v1176_v50 = vpop.f32.mrb[24].mxu0 }
 0x1d7   : > { %v846_v21 = vadd.f32 %v1176_v50, %v1663_v24  ;;  %v840_v53 = vpop.f32.mrb[25].mxu0 }
 0x1d8   : > { %v841_v54 = vadd.f32 %v840_v53, %v1657_v20 }
 0x1d9   : > { %v920_v55 = vadd.f32 %v846_v21, %v1681_v41 }
 0x1da   : > { %v919_v29 = vadd.f32 %v841_v54, %v1677_v36 }
 0x1db   : > { %v943_v58 = vadd.f32 %v1736_v25, %v920_v55 }
 0x1dc   : > { %v942_v59 = vadd.f32 %v1736_v25, %v919_v29 }
 0x1dd   : > { %959 = vst [vmem:[%s1743_s14 + $0x8] sm:$0xff] %v943_v58 }
 0x1de   : > { %958 = vst [vmem:[%s1743_s14] sm:$0xff] %v942_v59  ;;  %v1179_v24 = vpop.f32.mrb[26].mxu0 }
 0x1df   : > { %v856_v60 = vadd.f32 %v1179_v24, %v1675_v32  ;;  %v850_v20 = vpop.f32.mrb[27].mxu0 }
 0x1e0   : > { %v851_v41 = vadd.f32 %v850_v20, %v1669_v28 }
 0x1e1   : > { %v922_v36 = vadd.f32 %v856_v60, %v1689_v51 }
 0x1e2   : > { %v921_v63 = vadd.f32 %v851_v41, %v1685_v46 }
 0x1e3   : > { %v945_v0 = vadd.f32 %v1736_v25, %v922_v36 }
 0x1e4   : > { %v944_v1 = vadd.f32 %v1736_v25, %v921_v63 }
 0x1e5   : > { %961 = vst [vmem:[%s1743_s14 + $0x18] sm:$0xff] %v945_v0 }
 0x1e6   : > { %960 = vst [vmem:[%s1743_s14 + $0x10] sm:$0xff] %v944_v1  ;;  %v1182_v4 = vpop.f32.mrb[28].mxu0 }
 0x1e7   : > { %v866_v5 = vadd.f32 %v1182_v4, %v1683_v42  ;;  %v860_v6 = vpop.f32.mrb[29].mxu0 }
 0x1e8   : > { %v861_v32 = vadd.f32 %v860_v6, %v1679_v37 }
 0x1e9   : > { %v924_v28 = vadd.f32 %v866_v5, %v1697_v61 }
 0x1ea   : > { %v923_v51 = vadd.f32 %v861_v32, %v1693_v56 }
 0x1eb   : > { %v947_v46 = vadd.f32 %v1736_v25, %v924_v28 }
 0x1ec   : > { %v946_v9 = vadd.f32 %v1736_v25, %v923_v51 }
 0x1ed   : > { %963 = vst [vmem:[%s1743_s14 + $0x28] sm:$0xff] %v947_v46 }
 0x1ee   : > { %962 = vst [vmem:[%s1743_s14 + $0x20] sm:$0xff] %v946_v9  ;;  %v1185_v10 = vpop.f32.mrb[30].mxu0 }
 0x1ef   : > { %v876_v12 = vadd.f32 %v1185_v10, %v1691_v52  ;;  %v870_v13 = vpop.f32.mrb[31].mxu0 }
 0x1f0   : > { %v871_v42 = vadd.f32 %v870_v13, %v1687_v47 }
 0x1f1   : > { %v926_v37 = vadd.f32 %v876_v12, %v1705_v7 }
 0x1f2   : > { %v925_v61 = vadd.f32 %v871_v42, %v1701_v2 }
 0x1f3   : > { %v949_v56 = vadd.f32 %v1736_v25, %v926_v37 }
 0x1f4   : > { %v948_v15 = vadd.f32 %v1736_v25, %v925_v61 }
 0x1f5   : > { %965 = vst [vmem:[%s1743_s14 + $0x38] sm:$0xff] %v949_v56 }
 0x1f6   : > { %964 = vst [vmem:[%s1743_s14 + $0x30] sm:$0xff] %v948_v15  ;;  %v1188_v16 = vpop.f32.mrb[32].mxu0 }
 0x1f7   : > { %v886_v22 = vadd.f32 %v1188_v16, %v1699_v62  ;;  %v880_v26 = vpop.f32.mrb[33].mxu0 }
 0x1f8   : > { %v881_v52 = vadd.f32 %v880_v26, %v1695_v57 }
 0x1f9   : > { %v928_v47 = vadd.f32 %v886_v22, %v1711_v14 }
 0x1fa   : > { %v927_v7 = vadd.f32 %v881_v52, %v1709_v11 }
 0x1fb   : > { %v951_v2 = vadd.f32 %v1736_v25, %v928_v47 }
 0x1fc   : > { %v950_v33 = vadd.f32 %v1736_v25, %v927_v7 }
 0x1fd   : > { %967 = vst [vmem:[%s1743_s14 + $0x48] sm:$0xff] %v951_v2 }
 0x1fe   : > { %966 = vst [vmem:[%s1743_s14 + $0x40] sm:$0xff] %v950_v33  ;;  %v1191_v34 = vpop.f32.mrb[34].mxu0 }
 0x1ff   : > { %v896_v38 = vadd.f32 %v1191_v34, %v1707_v8  ;;  %v890_v39 = vpop.f32.mrb[35].mxu0 }
 0x200   : > { %v891_v62 = vadd.f32 %v890_v39, %v1703_v3 }
 0x201   : > { %v930_v57 = vadd.f32 %v896_v38, %v1715_v30 }
 0x202   : > { %v929_v14 = vadd.f32 %v891_v62, %v1713_v18 }
 0x203   : > { %v953_v11 = vadd.f32 %v1736_v25, %v930_v57 }
 0x204   : > { %v952_v43 = vadd.f32 %v1736_v25, %v929_v14 }
 0x205   : > { %969 = vst [vmem:[%s1743_s14 + $0x58] sm:$0xff] %v953_v11 }
 0x206   : > { %968 = vst [vmem:[%s1743_s14 + $0x50] sm:$0xff] %v952_v43  ;;  %v1194_v44 = vpop.f32.mrb[36].mxu0 }
 0x207   : > { %v906_v8 = vadd.f32 %v1194_v44, %v1661_v23  ;;  %v900_v48 = vpop.f32.mrb[37].mxu0 }
 0x208   : > { %v901_v49 = vadd.f32 %v900_v48, %v1655_v19 }
 0x209   : > { %v932_v3 = vadd.f32 %v906_v8, %v1721_v40 }
 0x20a   : > { %v931_v30 = vadd.f32 %v901_v49, %v1718_v35 }
 0x20b   : > { %v955_v18 = vadd.f32 %v1736_v25, %v932_v3 }
 0x20c   : > { %v954_v50 = vadd.f32 %v1736_v25, %v931_v30 }
 0x20d   : > { %971 = vst [vmem:[%s1743_s14 + $0x68] sm:$0xff] %v955_v18 }
 0x20e   : > { %970 = vst [vmem:[%s1743_s14 + $0x60] sm:$0xff] %v954_v50  ;;  %v1197_v21 = vpop.f32.mrb[38].mxu0 }
 0x20f   : > { %v916_v53 = vadd.f32 %v1197_v21, %v1673_v31  ;;  %v910_v23 = vpop.f32.mrb[39].mxu0 }
 0x210   : > { %v911_v19 = vadd.f32 %v910_v23, %v1667_v27 }
 0x211   : > { %v934_v35 = vadd.f32 %v916_v53, %v1727_v17 }
 0x212   : > { %v933_v40 = vadd.f32 %v911_v19, %v1724_v45 }
 0x213   : > { %v957_v54 = vadd.f32 %v1736_v25, %v934_v35 }
 0x214   : > { %v956_v27 = vadd.f32 %v1736_v25, %v933_v40 }
 0x215   : > { %973 = vst [vmem:[%s1743_s14 + $0x78] sm:$0xff] %v957_v54 }
 0x216   : > { %972 = vst [vmem:[%s1743_s14 + $0x70] sm:$0xff] %v956_v27 }
 0x217   : > { %1305 = shalt.err (!%p1302_p3)
}
 0x218   : > { %s1306_s29 = scalar_lea.hbm %s1805_s26, 2048  ;;  %s1310_s11 = scalar_lea.hbm %s1861_s6, 4096 }
 0x219   : > { %p1307_p4 = scmp.ne.s32.totalorder %s1805_s26, %s1306_s29  ;;  %p1311_p9 = scmp.lt.u32.totalorder %s1805_s26, %s1861_s6 }
 0x21a   : > { %p1312_p10 = scmp.lt.u32.totalorder %s1310_s11, %s1306_s29  ;;  %p1314_p12 = scmp.lt.u32.totalorder %s1306_s29, %s1805_s26 }
 0x21b   : > { %p1308_p7 = pnand %p1307_p4, %p1433_p5 }
 0x21c   : > { %p1313_p11 = por %p1312_p10, %p1311_p9 }
 0x21d   : > { %p1309_p8 = pneg %p1308_p7 }
 0x21e   : > { %p1315_p13 = por %p1314_p12, %p1313_p11 }
 0x220   : > { %p1316_p0 = pnand %p1315_p13, %p1309_p8 }
 0x222   : > { %1319 = shalt.err (!%p1316_p0)
}
 0x223   : > { %s1358_s16 = smov 128   ;;  %s1359_s19 = smov 8  }
 0x224   : > { %1250 = dma.vmem_to_hbm [thread:$0]  (%p1433_p5), %s1807_s17, 2048, %s1805_s26, %s1814_s25, %s1358_s16, %s1358_s16, %s1359_s19  }
 0x225 PF: > { %p1256_p1 = scmp.ge.s32.totalorder %s1354_s24, 2  ;;  %s1003_s20 = sand.u32 1, %s1342_s21  }
 0x226   : > { %s1004_s15 = scalar_lea.sflag [#allocation3], %s1003_s20 }
 0x227   : > { %p1253_p2 = pnand %p1256_p1, %p1437_p6 }
 0x229   : > { %1337 = dma.done.wait (!%p1253_p2), %s1004_s15, 2048  }
 0x22a   : > { %1339 = vsyncadd (!%p1253_p2), %s1004_s15, 4294965248  ;;  %p16_p3 = scmp.ge.s32.totalorder %s1420_s27, 4   ;;  %s1864_s21 = smov %s1346_s22 }
 0x22b   : > { %s1865_s22 = smov %s1350_s23  ;;  %s1866_s23 = smov %s1431_s30 }
 0x22c   : > { %s1867_s24 = smov %s1420_s27  ;;  %18 = sbr.rel (!%p16_p3) target bundleno = 3 (0x3), region = 82 }
 0x233   :  { %1009 = vsyncpa [#allocation3], 1 }
 0x234   :  { %1011 = vsyncpa [#allocation3 + $0x1], 1 }

</bundles_post_ra>
